<compile_context>
chip_gen: v7x
topology: tpu7x:2x2x1
jax: 0.10.0
libtpu: 0.0.40
codegen_flags: <defaults>
</compile_context>

<pallas_src>
import functools

import jax
import jax.numpy as jnp
from jax import lax
from jax.experimental import pallas as pl
from jax.experimental.pallas import tpu as pltpu

KD = KH = KW = 3
EPS = 1e-5
LANES = 128


# --------------------------------------------------------------------------
# Pass 1: conv (3 depth taps unrolled in one grid step) + per-step BN partials
# --------------------------------------------------------------------------
def _conv_stats_kernel(p0_ref, p1_ref, p2_ref, w_ref, conv_ref, sum_ref, ssq_ref):
    # Three back-to-back MXU matmuls against the VMEM-resident weight block.
    # (HW_t, 9*Cin) bf16 @ (9*Cin, Cout_pad) bf16 -> f32.
    acc = jnp.dot(p0_ref[...], w_ref[0], preferred_element_type=jnp.float32)
    acc = acc + jnp.dot(p1_ref[...], w_ref[1], preferred_element_type=jnp.float32)
    acc = acc + jnp.dot(p2_ref[...], w_ref[2], preferred_element_type=jnp.float32)

    # bf16 HBM intermediate (halves pass-1 writeback and pass-2 read traffic);
    # BN statistics come from the full-precision f32 accumulator.
    conv_ref[...] = acc.astype(conv_ref.dtype)
    sum_ref[...] = jnp.sum(acc, axis=0, keepdims=True)
    ssq_ref[...] = jnp.sum(acc * acc, axis=0, keepdims=True)


# --------------------------------------------------------------------------
# Pass 2: y = max(conv * scale + shift, 0)   (scale/shift = pre-folded BN)
# --------------------------------------------------------------------------
def _bn_act_kernel(conv_ref, scale_ref, shift_ref, out_ref, *, relu):
    y = conv_ref[...].astype(jnp.float32) * scale_ref[...] + shift_ref[...]
    if relu:
        y = jnp.maximum(y, 0.0)
    out_ref[...] = y


def _pick_tile_hw(hw, cap=1024):
    """Largest multiple-of-8 divisor of hw that is <= cap (else full hw).

    An exact divisor is required in pass 1 so there are no ragged HW blocks
    (out-of-bounds rows would contaminate the BN statistics)."""
    if hw <= cap:
        return hw
    for cand in range(cap - cap % 8, 0, -8):
        if hw % cand == 0:
            return cand
    return hw


def _pick_tile_m(m, cap=2048):
    """Pass-2 M tile.  No divisor requirement: the grid uses pl.cdiv and the
    ragged last block is masked on store (kernel is purely elementwise)."""
    return m if m <= cap else cap


def conv3d_block(x_ncdhw, w_oidhw, gamma, beta, *, activation="relu",
                 channels_last_out=False):
    """x: (N, Cin, D, H, W), w: (Cout, Cin, 3, 3, 3) -> (N, Cout, D, H, W)."""
    if activation not in ("relu", None):
        raise Exception(f"unsupported activation: {activation}")

    N, Cin, D, H, W = x_ncdhw.shape
    Cout = w_oidhw.shape[0]
    Cout_pad = ((Cout + LANES - 1) // LANES) * LANES
    HW = H * W
    K2 = KH * KW * Cin          # spatial-tap contraction length
    M = N * D * HW

    # ---- wrapper glue: NCDHW -> NDHWC in bf16, 'same' pad, 9-tap im2col ----
    # Depth stays un-expanded; the 3 depth taps are realized as overlapping
    # depth-shifted BlockSpec windows inside pass 1 (no 27x HBM copy).
    x = jnp.transpose(x_ncdhw, (0, 2, 3, 4, 1)).astype(jnp.bfloat16)
    xp = jnp.pad(x, ((0, 0), (1, 1), (1, 1), (1, 1), (0, 0)))
    taps = [xp[:, :, kh:kh + H, kw:kw + W, :]
            for kh in range(KH) for kw in range(KW)]
    patches = jnp.stack(taps, axis=4).reshape(N, D + 2, HW, K2)   # bf16

    # weights: (Cout, Cin, kd, kh, kw) -> (kd, (kh, kw, Cin), Cout_pad), bf16
    wt = jnp.transpose(w_oidhw, (2, 3, 4, 1, 0)).reshape(KD, K2, Cout)
    wt = jnp.pad(wt, ((0, 0), (0, 0), (0, Cout_pad - Cout))).astype(jnp.bfloat16)

    hw_t = _pick_tile_hw(HW)
    T = HW // hw_t

    flops = 2 * M * (KD * K2) * Cout_pad
    stats_bytes = 2 * N * D * T * Cout_pad * 4
    bytes_accessed = (KD * patches.size * 2      # each depth slab read ~3x
                      + wt.size * 2
                      + M * Cout_pad * 2         # bf16 conv writeback
                      + stats_bytes)

    # Explicit VMEM budget (v7x has 64 MiB physical / 32 MiB default scoped).
    vmem_est = (3 * 2 * hw_t * K2 * 2            # 3 tap inputs, double-buffered
                + KD * K2 * Cout_pad * 2         # resident weights
                + 2 * hw_t * Cout_pad * 2        # bf16 conv out, double-buffered
                + 2 * hw_t * Cout_pad * 4        # f32 accumulator temporaries
                + 4 * 2 * Cout_pad * 4)          # stats blocks
    vmem_limit = int(min(max(2 * vmem_est, 32 * 1024 * 1024), 64 * 1024 * 1024))

    conv, csum, cssq = pl.pallas_call(
        _conv_stats_kernel,
        out_shape=(
            jax.ShapeDtypeStruct((N, D, HW, Cout_pad), jnp.bfloat16),
            jax.ShapeDtypeStruct((N, D, T, 1, Cout_pad), jnp.float32),
            jax.ShapeDtypeStruct((N, D, T, 1, Cout_pad), jnp.float32),
        ),
        grid=(N, D, T),
        in_specs=[
            # overlapping depth windows: same array, depth-shifted index maps.
            # TODO(synk): pipeline_mode=pl.Buffered(3) here if pass-1 DMA is
            # still exposed on v5e (128 MiB VMEM headroom).
            pl.BlockSpec((None, None, hw_t, K2), lambda n, d, t: (n, d, t, 0)),
            pl.BlockSpec((None, None, hw_t, K2), lambda n, d, t: (n, d + 1, t, 0)),
            pl.BlockSpec((None, None, hw_t, K2), lambda n, d, t: (n, d + 2, t, 0)),
            # weights: constant block index -> DMA'd once, VMEM-resident.
            pl.BlockSpec((KD, K2, Cout_pad), lambda n, d, t: (0, 0, 0)),
        ],
        out_specs=(
            pl.BlockSpec((None, None, hw_t, Cout_pad),
                         lambda n, d, t: (n, d, t, 0)),
            pl.BlockSpec((None, None, None, 1, Cout_pad),
                         lambda n, d, t: (n, d, t, 0, 0)),
            pl.BlockSpec((None, None, None, 1, Cout_pad),
                         lambda n, d, t: (n, d, t, 0, 0)),
        ),
        # Per-step partial stats -> no resident accumulator -> every axis is
        # safe to shard across TensorCores (v7x megacore).
        compiler_params=pltpu.CompilerParams(
            dimension_semantics=("parallel", "parallel", "parallel"),
            vmem_limit_bytes=vmem_limit),
        cost_estimate=pl.CostEstimate(
            flops=flops, transcendentals=0, bytes_accessed=bytes_accessed),
    )(patches, patches, patches, wt)

    # ---- tiny per-channel BN fold in plain JAX (Cout_pad scalars) ----------
    total = jnp.sum(csum, axis=(0, 1, 2, 3))
    total_sq = jnp.sum(cssq, axis=(0, 1, 2, 3))
    mean = total / M
    # TODO(synk): E[x^2] - mean^2 can cancel for large-mean activations; a
    # mean-subtracted second reduction over the conv intermediate would be
    # fully robust.  The clamp guards the f32 cancellation here.
    var = jnp.maximum(total_sq / M - mean * mean, 0.0)
    gamma_p = jnp.pad(gamma.astype(jnp.float32), (0, Cout_pad - Cout))
    beta_p = jnp.pad(beta.astype(jnp.float32), (0, Cout_pad - Cout))
    scale = gamma_p * lax.rsqrt(var + EPS)
    shift = beta_p - mean * scale
    scale = scale.reshape(1, Cout_pad)
    shift = shift.reshape(1, Cout_pad)

    # ---- pass 2: normalize + activation, lane-dense, M-tiled ----------------
    conv2d = conv.reshape(M, Cout_pad)               # bf16, free reshape
    tile_m = _pick_tile_m(M)
    out = pl.pallas_call(
        functools.partial(_bn_act_kernel, relu=(activation == "relu")),
        out_shape=jax.ShapeDtypeStruct((M, Cout_pad), jnp.float32),
        grid=(pl.cdiv(M, tile_m),),
        in_specs=[
            pl.BlockSpec((tile_m, Cout_pad), lambda i: (i, 0)),
            pl.BlockSpec((1, Cout_pad), lambda i: (0, 0)),
            pl.BlockSpec((1, Cout_pad), lambda i: (0, 0)),
        ],
        out_specs=pl.BlockSpec((tile_m, Cout_pad), lambda i: (i, 0)),
        compiler_params=pltpu.CompilerParams(
            dimension_semantics=("parallel",)),
        cost_estimate=pl.CostEstimate(
            flops=3 * M * Cout_pad, transcendentals=0,
            bytes_accessed=M * Cout_pad * (2 + 4) + 2 * Cout_pad * 4),
    )(conv2d, scale, shift)

    # Keep kernel stores lane-dense at Cout_pad; slice the channel pad here.
    out = out[:, :Cout].reshape(N, D, H, W, Cout)
    if channels_last_out:
        # Cheaper hand-off for a channels-last downstream layer: skips the
        # full read+write NCDHW epilogue transpose.
        return out
    return jnp.transpose(out, (0, 4, 1, 2, 3))       # back to NCDHW


def reference(x, w, gamma, beta):
    """Pure-JAX reference mirroring the PyTorch forward (training-mode BN)."""
    conv = lax.conv_general_dilated(
        x.astype(jnp.float32), w.astype(jnp.float32),
        window_strides=(1, 1, 1), padding="SAME",
        dimension_numbers=("NCDHW", "OIDHW", "NCDHW"))
    mean = jnp.mean(conv, axis=(0, 2, 3, 4), keepdims=True)
    var = jnp.mean((conv - mean) ** 2, axis=(0, 2, 3, 4), keepdims=True)
    y = (conv - mean) / jnp.sqrt(var + EPS)
    y = y * gamma.reshape(1, -1, 1, 1, 1) + beta.reshape(1, -1, 1, 1, 1)
    return jnp.maximum(y, 0.0)


if __name__ == "__main__":
    N, Cin, Cout, D, H, W = 2, 4, 8, 8, 8, 8

    key = jax.random.PRNGKey(0)
    kx, kw_, kg, kb = jax.random.split(key, 4)
    x = jax.random.normal(kx, (N, Cin, D, H, W), dtype=jnp.float32)
    weight = jax.random.normal(kw_, (Cout, Cin, KD, KH, KW), dtype=jnp.float32) * 0.1
    gamma = 1.0 + 0.1 * jax.random.normal(kg, (Cout,), dtype=jnp.float32)
    beta = 0.1 * jax.random.normal(kb, (Cout,), dtype=jnp.float32)

    out = jax.jit(conv3d_block)(x, weight, gamma, beta)
    out = jax.block_until_ready(out)

    ref = jax.block_until_ready(reference(x, weight, gamma, beta))
    assert out.shape == (N, Cout, D, H, W), out.shape
    max_err = float(jnp.max(jnp.abs(out - ref)))
    assert max_err < 5e-2, f"max abs error {max_err}"

    print("KERNEL_OK")
</pallas_src>

<mosaic_0001>
module attributes {stable_mosaic.version = 11 : i64} {
  func.func @_conv_stats_kernel(%arg0: i32, %arg1: i32, %arg2: i32, %arg3: memref<1x1x64x36xbf16, #tpu.memory_space<vmem>>, %arg4: memref<1x1x64x36xbf16, #tpu.memory_space<vmem>>, %arg5: memref<1x1x64x36xbf16, #tpu.memory_space<vmem>>, %arg6: memref<3x36x128xbf16, #tpu.memory_space<vmem>>, %arg7: memref<1x1x64x128xbf16, #tpu.memory_space<vmem>>, %arg8: memref<1x1x1x1x128xf32, #tpu.memory_space<vmem>>, %arg9: memref<1x1x1x1x128xf32, #tpu.memory_space<vmem>>) attributes {dimension_semantics = [#tpu.dimension_semantics<parallel>, #tpu.dimension_semantics<parallel>, #tpu.dimension_semantics<parallel>], iteration_bounds = array<i64: 2, 8, 1>, scalar_prefetch = 0 : i64, scratch_operands = 0 : i64, tpu.core_type = #tpu.core_type<tc>, window_params = [{transform_indices = @transform_0, window_bounds = array<i64: 1, 1, 64, 36>}, {transform_indices = @transform_1, window_bounds = array<i64: 1, 1, 64, 36>}, {transform_indices = @transform_2, window_bounds = array<i64: 1, 1, 64, 36>}, {pipeline_mode = #tpu.pipeline_mode<synchronous>, transform_indices = @transform_3, window_bounds = array<i64: 3, 36, 128>}, {transform_indices = @transform_4, window_bounds = array<i64: 1, 1, 64, 128>}, {transform_indices = @transform_5, window_bounds = array<i64: 1, 1, 1, 1, 128>}, {transform_indices = @transform_6, window_bounds = array<i64: 1, 1, 1, 1, 128>}]} {
    %c0 = arith.constant 0 : index
    %c0_0 = arith.constant 0 : index
    %c0_1 = arith.constant 0 : index
    %c0_2 = arith.constant 0 : index
    %0 = vector.load %arg3[%c0, %c0_0, %c0_1, %c0_2] : memref<1x1x64x36xbf16, #tpu.memory_space<vmem>>, vector<1x1x64x36xbf16>
    %1 = vector.shape_cast %0 : vector<1x1x64x36xbf16> to vector<64x36xbf16>
    %c0_3 = arith.constant 0 : index
    %c0_4 = arith.constant 0 : index
    %c0_5 = arith.constant 0 : index
    %2 = vector.load %arg6[%c0_3, %c0_4, %c0_5] : memref<3x36x128xbf16, #tpu.memory_space<vmem>>, vector<1x36x128xbf16>
    %3 = vector.shape_cast %2 : vector<1x36x128xbf16> to vector<36x128xbf16>
    %cst = arith.constant dense<0.000000e+00> : vector<64x128xf32>
    %4 = tpu.matmul %1, %3, %cst {dimension_numbers = #tpu.dot_dimension_numbers<[1], [0], [0], [1], [0, 0, 1, 1], [], []>} : vector<64x36xbf16>, vector<36x128xbf16>, vector<64x128xf32> -> vector<64x128xf32>
    %c0_6 = arith.constant 0 : index
    %c0_7 = arith.constant 0 : index
    %c0_8 = arith.constant 0 : index
    %c0_9 = arith.constant 0 : index
    %5 = vector.load %arg4[%c0_6, %c0_7, %c0_8, %c0_9] : memref<1x1x64x36xbf16, #tpu.memory_space<vmem>>, vector<1x1x64x36xbf16>
    %6 = vector.shape_cast %5 : vector<1x1x64x36xbf16> to vector<64x36xbf16>
    %c1 = arith.constant 1 : index
    %c0_10 = arith.constant 0 : index
    %c0_11 = arith.constant 0 : index
    %7 = vector.load %arg6[%c1, %c0_10, %c0_11] : memref<3x36x128xbf16, #tpu.memory_space<vmem>>, vector<1x36x128xbf16>
    %8 = vector.shape_cast %7 : vector<1x36x128xbf16> to vector<36x128xbf16>
    %cst_12 = arith.constant dense<0.000000e+00> : vector<64x128xf32>
    %9 = tpu.matmul %6, %8, %cst_12 {dimension_numbers = #tpu.dot_dimension_numbers<[1], [0], [0], [1], [0, 0, 1, 1], [], []>} : vector<64x36xbf16>, vector<36x128xbf16>, vector<64x128xf32> -> vector<64x128xf32>
    %10 = arith.addf %4, %9 : vector<64x128xf32>
    %c0_13 = arith.constant 0 : index
    %c0_14 = arith.constant 0 : index
    %c0_15 = arith.constant 0 : index
    %c0_16 = arith.constant 0 : index
    %11 = vector.load %arg5[%c0_13, %c0_14, %c0_15, %c0_16] : memref<1x1x64x36xbf16, #tpu.memory_space<vmem>>, vector<1x1x64x36xbf16>
    %12 = vector.shape_cast %11 : vector<1x1x64x36xbf16> to vector<64x36xbf16>
    %c2 = arith.constant 2 : index
    %c0_17 = arith.constant 0 : index
    %c0_18 = arith.constant 0 : index
    %13 = vector.load %arg6[%c2, %c0_17, %c0_18] : memref<3x36x128xbf16, #tpu.memory_space<vmem>>, vector<1x36x128xbf16>
    %14 = vector.shape_cast %13 : vector<1x36x128xbf16> to vector<36x128xbf16>
    %cst_19 = arith.constant dense<0.000000e+00> : vector<64x128xf32>
    %15 = tpu.matmul %12, %14, %cst_19 {dimension_numbers = #tpu.dot_dimension_numbers<[1], [0], [0], [1], [0, 0, 1, 1], [], []>} : vector<64x36xbf16>, vector<36x128xbf16>, vector<64x128xf32> -> vector<64x128xf32>
    %16 = arith.addf %10, %15 : vector<64x128xf32>
    %17 = arith.truncf %16 : vector<64x128xf32> to vector<64x128xbf16>
    %c0_20 = arith.constant 0 : index
    %c0_21 = arith.constant 0 : index
    %c0_22 = arith.constant 0 : index
    %c0_23 = arith.constant 0 : index
    %18 = vector.load %arg7[%c0_20, %c0_21, %c0_22, %c0_23] : memref<1x1x64x128xbf16, #tpu.memory_space<vmem>>, vector<1x1x64x128xbf16>
    %19 = vector.shape_cast %18 : vector<1x1x64x128xbf16> to vector<64x128xbf16>
    %20 = vector.shape_cast %17 : vector<64x128xbf16> to vector<1x1x64x128xbf16>
    tpu.vector_store %arg7[%c0_20, %c0_21, %c0_22, %c0_23], %20 {strides = array<i32>} : memref<1x1x64x128xbf16, #tpu.memory_space<vmem>>, vector<1x1x64x128xbf16>,
    %cst_24 = arith.constant dense<0.000000e+00> : vector<128xf32>
    %21 = vector.multi_reduction <add>, %16, %cst_24 [0] : vector<64x128xf32> to vector<128xf32>
    %22 = vector.shape_cast %21 : vector<128xf32> to vector<1x128xf32>
    %c0_25 = arith.constant 0 : index
    %c0_26 = arith.constant 0 : index
    %c0_27 = arith.constant 0 : index
    %c0_28 = arith.constant 0 : index
    %c0_29 = arith.constant 0 : index
    %23 = vector.load %arg8[%c0_25, %c0_26, %c0_27, %c0_28, %c0_29] : memref<1x1x1x1x128xf32, #tpu.memory_space<vmem>>, vector<1x1x1x1x128xf32>
    %24 = vector.shape_cast %23 : vector<1x1x1x1x128xf32> to vector<1x128xf32>
    %25 = vector.shape_cast %22 : vector<1x128xf32> to vector<1x1x1x1x128xf32>
    tpu.vector_store %arg8[%c0_25, %c0_26, %c0_27, %c0_28, %c0_29], %25 {strides = array<i32>} : memref<1x1x1x1x128xf32, #tpu.memory_space<vmem>>, vector<1x1x1x1x128xf32>,
    %26 = arith.mulf %16, %16 : vector<64x128xf32>
    %cst_30 = arith.constant dense<0.000000e+00> : vector<128xf32>
    %27 = vector.multi_reduction <add>, %26, %cst_30 [0] : vector<64x128xf32> to vector<128xf32>
    %28 = vector.shape_cast %27 : vector<128xf32> to vector<1x128xf32>
    %c0_31 = arith.constant 0 : index
    %c0_32 = arith.constant 0 : index
    %c0_33 = arith.constant 0 : index
    %c0_34 = arith.constant 0 : index
    %c0_35 = arith.constant 0 : index
    %29 = vector.load %arg9[%c0_31, %c0_32, %c0_33, %c0_34, %c0_35] : memref<1x1x1x1x128xf32, #tpu.memory_space<vmem>>, vector<1x1x1x1x128xf32>
    %30 = vector.shape_cast %29 : vector<1x1x1x1x128xf32> to vector<1x128xf32>
    %31 = vector.shape_cast %28 : vector<1x128xf32> to vector<1x1x1x1x128xf32>
    tpu.vector_store %arg9[%c0_31, %c0_32, %c0_33, %c0_34, %c0_35], %31 {strides = array<i32>} : memref<1x1x1x1x128xf32, #tpu.memory_space<vmem>>, vector<1x1x1x1x128xf32>,
    return
  }
  func.func @transform_0(%arg0: i32, %arg1: i32, %arg2: i32) -> (i32, i32, i32, i32) {
    %c0_i32 = arith.constant 0 : i32
    %c0_i32_0 = arith.constant 0 : i32
    return %arg0, %arg1, %arg2, %c0_i32 : i32, i32, i32, i32
  }
  func.func @transform_1(%arg0: i32, %arg1: i32, %arg2: i32) -> (i32, i32, i32, i32) {
    %c1_i32 = arith.constant 1 : i32
    %0 = arith.addi %arg1, %c1_i32 : i32
    %c0_i32 = arith.constant 0 : i32
    %c0_i32_0 = arith.constant 0 : i32
    return %arg0, %0, %arg2, %c0_i32 : i32, i32, i32, i32
  }
  func.func @transform_2(%arg0: i32, %arg1: i32, %arg2: i32) -> (i32, i32, i32, i32) {
    %c2_i32 = arith.constant 2 : i32
    %0 = arith.addi %arg1, %c2_i32 : i32
    %c0_i32 = arith.constant 0 : i32
    %c0_i32_0 = arith.constant 0 : i32
    return %arg0, %0, %arg2, %c0_i32 : i32, i32, i32, i32
  }
  func.func @transform_3(%arg0: i32, %arg1: i32, %arg2: i32) -> (i32, i32, i32) {
    %c0_i32 = arith.constant 0 : i32
    %c0_i32_0 = arith.constant 0 : i32
    %c0_i32_1 = arith.constant 0 : i32
    %c0_i32_2 = arith.constant 0 : i32
    return %c0_i32, %c0_i32_0, %c0_i32_1 : i32, i32, i32
  }
  func.func @transform_4(%arg0: i32, %arg1: i32, %arg2: i32) -> (i32, i32, i32, i32) {
    %c0_i32 = arith.constant 0 : i32
    %c0_i32_0 = arith.constant 0 : i32
    return %arg0, %arg1, %arg2, %c0_i32 : i32, i32, i32, i32
  }
  func.func @transform_5(%arg0: i32, %arg1: i32, %arg2: i32) -> (i32, i32, i32, i32, i32) {
    %c0_i32 = arith.constant 0 : i32
    %c0_i32_0 = arith.constant 0 : i32
    %c0_i32_1 = arith.constant 0 : i32
    return %arg0, %arg1, %arg2, %c0_i32, %c0_i32_0 : i32, i32, i32, i32, i32
  }
  func.func @transform_6(%arg0: i32, %arg1: i32, %arg2: i32) -> (i32, i32, i32, i32, i32) {
    %c0_i32 = arith.constant 0 : i32
    %c0_i32_0 = arith.constant 0 : i32
    %c0_i32_1 = arith.constant 0 : i32
    return %arg0, %arg1, %arg2, %c0_i32, %c0_i32_0 : i32, i32, i32, i32, i32
  }
}

module attributes {stable_mosaic.version = 11 : i64} {
  func.func @_bn_act_kernel(%arg0: i32, %arg1: memref<1024x128xbf16, #tpu.memory_space<vmem>>, %arg2: memref<1x128xf32, #tpu.memory_space<vmem>>, %arg3: memref<1x128xf32, #tpu.memory_space<vmem>>, %arg4: memref<1024x128xf32, #tpu.memory_space<vmem>>) attributes {dimension_semantics = [#tpu.dimension_semantics<parallel>], iteration_bounds = array<i64: 1>, scalar_prefetch = 0 : i64, scratch_operands = 0 : i64, tpu.core_type = #tpu.core_type<tc>, window_params = [{transform_indices = @transform_0, window_bounds = array<i64: 1024, 128>}, {pipeline_mode = #tpu.pipeline_mode<synchronous>, transform_indices = @transform_1, window_bounds = array<i64: 1, 128>}, {pipeline_mode = #tpu.pipeline_mode<synchronous>, transform_indices = @transform_2, window_bounds = array<i64: 1, 128>}, {transform_indices = @transform_3, window_bounds = array<i64: 1024, 128>}]} {
    %c0 = arith.constant 0 : index
    %c0_0 = arith.constant 0 : index
    %0 = vector.load %arg1[%c0, %c0_0] : memref<1024x128xbf16, #tpu.memory_space<vmem>>, vector<1024x128xbf16>
    %1 = arith.extf %0 : vector<1024x128xbf16> to vector<1024x128xf32>
    %c0_1 = arith.constant 0 : index
    %c0_2 = arith.constant 0 : index
    %2 = vector.load %arg2[%c0_1, %c0_2] : memref<1x128xf32, #tpu.memory_space<vmem>>, vector<1x128xf32>
    %3 = vector.broadcast %2 : vector<1x128xf32> to vector<1024x128xf32>
    %4 = arith.mulf %1, %3 : vector<1024x128xf32>
    %c0_3 = arith.constant 0 : index
    %c0_4 = arith.constant 0 : index
    %5 = vector.load %arg3[%c0_3, %c0_4] : memref<1x128xf32, #tpu.memory_space<vmem>>, vector<1x128xf32>
    %6 = vector.broadcast %5 : vector<1x128xf32> to vector<1024x128xf32>
    %7 = arith.addf %4, %6 : vector<1024x128xf32>
    %cst = arith.constant 0.000000e+00 : f32
    %8 = vector.broadcast %cst : f32 to vector<1024x128xf32>
    %9 = arith.maximumf %7, %8 : vector<1024x128xf32>
    %c0_5 = arith.constant 0 : index
    %c0_6 = arith.constant 0 : index
    %10 = vector.load %arg4[%c0_5, %c0_6] : memref<1024x128xf32, #tpu.memory_space<vmem>>, vector<1024x128xf32>
    tpu.vector_store %arg4[%c0_5, %c0_6], %9 {strides = array<i32>} : memref<1024x128xf32, #tpu.memory_space<vmem>>, vector<1024x128xf32>,
    return
  }
  func.func @transform_0(%arg0: i32) -> (i32, i32) {
    %c0_i32 = arith.constant 0 : i32
    %c0_i32_0 = arith.constant 0 : i32
    return %arg0, %c0_i32 : i32, i32
  }
  func.func @transform_1(%arg0: i32) -> (i32, i32) {
    %c0_i32 = arith.constant 0 : i32
    %c0_i32_0 = arith.constant 0 : i32
    %c0_i32_1 = arith.constant 0 : i32
    return %c0_i32, %c0_i32_0 : i32, i32
  }
  func.func @transform_2(%arg0: i32) -> (i32, i32) {
    %c0_i32 = arith.constant 0 : i32
    %c0_i32_0 = arith.constant 0 : i32
    %c0_i32_1 = arith.constant 0 : i32
    return %c0_i32, %c0_i32_0 : i32, i32
  }
  func.func @transform_3(%arg0: i32) -> (i32, i32) {
    %c0_i32 = arith.constant 0 : i32
    %c0_i32_0 = arith.constant 0 : i32
    return %arg0, %c0_i32 : i32, i32
  }
}

</mosaic_0001>

<bundles_post_ra>
// kernel: conv3d_block.2
= control target key start
LH: loop header
LB: loop body
LE: loop exit
PB: predicated region body
PF: predicated region fallthrough
CT: control target
= control target key end

     0   :  { %s1553_s21 = smov 0   ;;  %s1555_s22 = smov 0   ;;  %s1684_s0 = inlined_call_operand.vmem [shape: bf16[2,10,64,36], index: 0, kind: input, shape index: {}, may-alias: {0,1,2}]   ;;  %s1685_s1 = inlined_call_operand.vmem [shape: bf16[2,10,64,36], index: 1, kind: input, shape index: {}, may-alias: {0,1,2}]   ;;  %s1686_s2 = inlined_call_operand.vmem [shape: bf16[2,10,64,36], index: 2, kind: input, shape index: {}, may-alias: {0,1,2}]   ;;  %s1687_s3 = inlined_call_operand.vmem [shape: bf16[3,36,128], index: 3, kind: input, shape index: {}]   ;;  %s1688_s4 = inlined_call_operand.vmem [shape: bf16[2,8,64,128], index: 4, kind: output, shape index: {0}]   ;;  %s1689_s5 = inlined_call_operand.vmem [shape: f32[2,8,1,1,128], index: 5, kind: output, shape index: {1}]   ;;  %s1690_s6 = inlined_call_operand.vmem [shape: f32[2,8,1,1,128], index: 6, kind: output, shape index: {2}]  }
   0x1   :  { %s1557_s23 = smov 0   ;;  %s1559_s24 = smov 0  }
   0x2   :  { %s1561_s25 = smov 0  }
   0x3 LB: > { %s32_s26 = sadd.s32 1, %s1508_s23  ;;  %s36_s27 = sadd.s32 1, %s1512_s24  ;;  %s1516_s25 = sphi %s1561_s25, %s17_s25   ;;  %s1512_s24 = sphi %s1559_s24, %s1694_s24   ;;  %s1508_s23 = sphi %s1557_s23, %s1693_s23   ;;  %s1504_s22 = sphi %s1555_s22, %s1692_s22   ;;  %s1500_s21 = sphi %s1553_s21, %s1691_s21  }
   0x4   : > { %p34_p0 = scmp.ge.s32.totalorder %s32_s26, 8  ;;  %p1231_p1 = scmp.ge.s32.totalorder %s1516_s25, 1 }
   0x5   : > { %p315_p2 = scmp.lt.s32.totalorder %s1516_s25, 17 }
   0x6   : > { %s1696_s26 = smov (%p34_p0, %s32_s26), 0  ;;  %s1698_s27 = smov (!%p34_p0, %s36_s27), %s1512_s24 }
   0x7   : > { %p316_p3 = pnand %p1231_p1, %p315_p2  ;;  %p38_p4 = scmp.ge.s32.totalorder %s1698_s27, 2 }
   0x8   : > { %v1457_v0 = vld [vmem:[%s1687_s3 + $0x14] sm:$0xff] (!%p316_p3)   ;;  %vm565_vm0 = vcmask (!%p316_p3), 1041408   ;;  %v1458_v1 = vld [vmem:[%s1687_s3] sm:$0xff] (!%p316_p3)   ;;  %p410_p5 = scmp.lt.s32.totalorder (!%p316_p3), %s1504_s22, 1  ;;  %s423_s10 = sadd.s32 (!%p316_p3), 1, %s1500_s21  ;;  %v1460_v3 = vld [vmem:[%s1687_s3 + $0x8] sm:$0xff] (!%p316_p3)  }
   0x9   : > { %s1700_s27 = smov (%p38_p4, %s1698_s27), 0  ;;  %319 = sbr.rel (%p316_p3) target bundleno = 289 (0x121), region = 36 }
   0xa   : > { %1348 = vmatprep.subr.bf16.mxu1 (!%p316_p3), %v1457_v0  ;;  %v1459_v2 = vld [vmem:[%s1687_s3 + $0x1c] sm:$0xff] (!%p316_p3)   ;;  %1362 = vmatprep.subr.bf16.mxu0 (!%p316_p3), %v1458_v1  ;;  %v1461_v4 = vld [vmem:[%s1687_s3 + $0x24] ss:$0 sps:$4 sm:$0x33] (!%p316_p3)   ;;  %p427_p6 = scmp.lt.s32.totalorder (!%p316_p3), %s423_s10, 9  ;;  %v1467_v7 = vld [vmem:[%s1687_s3 + $0x28] sm:$0xff] (!%p316_p3)  }
   0xb   : > { %1349 = vmatpush3.bf16.msra.mxu1 (!%p316_p3), %v1457_v0  ;;  %1363 = vmatpush3.bf16.msra.mxu0 (!%p316_p3), %v1458_v1  ;;  %v1462_v5 = vld [vmem:[%s1687_s3 + $0x10] ss:$0 sps:$4 sm:$0x33] (!%p316_p3)   ;;  %v567_v6 = vsel (!%p316_p3), %vm565_vm0, %v1461_v4, 0  ;;  %p412_p7 = scmp.lt.s32.totalorder (!%p316_p3), %s1500_s21, 9  ;;  %s439_s29 = sadd.s32 (!%p316_p3), 2, %s1500_s21 }
   0xc   : > { %1350 = vmatprep.subr.bf16.mxu1 (!%p316_p3), %v1459_v2  ;;  %1364 = vmatprep.subr.bf16.mxu0 (!%p316_p3), %v1460_v3  ;;  %v682_v8 = vsel (!%p316_p3), %vm565_vm0, %v1462_v5, 0  ;;  %p443_p8 = scmp.lt.s32.totalorder (!%p316_p3), %s439_s29, 9  ;;  %vm552_vm1 = vcmask (!%p316_p3), 293888   ;;  %v1468_v9 = vld [vmem:[%s1687_s3 + $0x30] sm:$0xff] (!%p316_p3)   ;;  %p458_p9 = scmp.lt.s32.totalorder (!%p316_p3), %s1500_s21, 7 }
   0xd   : > { %v1473_v14 = vld [vmem:[%s1687_s3 + $0x38] ss:$0 sps:$4 sm:$0x33] (!%p316_p3)  }
   0xe   : > { %v811_v18 = vsel (!%p316_p3), %vm565_vm0, %v1473_v14, 0 }
   0xf   : > { %1351 = vmatpush3.bf16.msra.mxu1 (!%p316_p3), %v1459_v2  ;;  %1365 = vmatpush3.bf16.msra.mxu0 (!%p316_p3), %v1460_v3 }
  0x10   : > { %s1702_s22 = smov (!%p410_p5, %s1504_s22), 1  ;;  %s1704_s10 = smov (!%p427_p6, %s423_s10), 9  ;;  %1412 = vmatprep.subr.msk.bf16.mxu1 %vm565_vm0, %v1461_v4  ;;  %1413 = vmatprep.subr.msk.bf16.mxu0 %vm565_vm0, %v1462_v5 }
  0x11   : > { %s1607_s17 = smul.u32 80, %s1702_s22  ;;  %s1234_s20 = sshll.u32 %s1704_s10, 3 }
  0x12   : > { %s413_s10 = scalar_select %p412_p7, %s1500_s21, 9 }
  0x13   : > { %s434_s28 = sadd.s32 %s1607_s17, %s1234_s20  ;;  %1353 = vmatpush3.bf16.msra.mxu1 %v567_v6  ;;  %1367 = vmatpush3.bf16.msra.mxu0 %v682_v8  ;;  %s1706_s29 = smov (!%p443_p8, %s439_s29), 9 }
  0x14   : > { %s1235_s30 = sshll.u32 %s434_s28, 2  ;;  %1390 = vmatprep.subr.bf16.mxu1 %v1467_v7  ;;  %1376 = vmatprep.subr.bf16.mxu0 %v1467_v7  ;;  %s1232_s13 = sshll.u32 %s413_s10, 3 }
  0x15   : > { %s436_s9 = scalar_lea.vmem %s1685_s1, %s1235_s30  ;;  %s419_s14 = sadd.s32 %s1607_s17, %s1232_s13 }
  0x16   : > { %v1463_v10 = vld [vmem:[%s436_s9] sm:$0xff]   ;;  %v1465_v11 = vld [vmem:[%s436_s9 + $0x8] sm:$0xff]   ;;  %v1469_v12 = vld [vmem:[%s436_s9 + $0x10] sm:$0xff]   ;;  %s1236_s15 = sshll.u32 %s1706_s29, 3  ;;  %s1233_s16 = sshll.u32 %s419_s14, 2 }
  0x17   : > { %1354 = vmatprep.mubr.msk.bf16.mxu1 %vm552_vm1, %v1463_v10  ;;  %s450_s18 = sadd.s32 %s1607_s17, %s1236_s15  ;;  %s421_s28 = scalar_lea.vmem %s1684_s0, %s1233_s16  ;;  %v1471_v13 = vld [vmem:[%s436_s9 + $0x18] sm:$0xff]  }
  0x18   : > { %1355 = vmatmul.mubr.msk.bf16.vlgmr.msra.gmra.mrb[0].mxu1 %vm552_vm1, %v1465_v11  ;;  %s1237_s8 = sshll.u32 %s450_s18, 2  ;;  %v1464_v15 = vld [vmem:[%s421_s28] sm:$0xff]   ;;  %v1466_v16 = vld [vmem:[%s421_s28 + $0x8] sm:$0xff]   ;;  %v1470_v17 = vld [vmem:[%s421_s28 + $0x10] sm:$0xff]   ;;  %s1708_s21 = smov (!%p458_p9, %s1500_s21), 7 }
  0x19   : > { %1393 = vmatpush3.bf16.msra.mxu1 %v1467_v7  ;;  %1358 = vmatprep.mubr.msk.bf16.mxu1 %vm552_vm1, %v1469_v12  ;;  %s452_s17 = scalar_lea.vmem %s1686_s2, %s1237_s8  ;;  %v1472_v20 = vld [vmem:[%s421_s28 + $0x18] sm:$0xff]   ;;  %s1238_s9 = sshll.u32 %s1708_s21, 3 }
  0x1a   : > { %1391 = vmatprep.subr.bf16.mxu1 %v1468_v9  ;;  %1368 = vmatprep.mubr.msk.bf16.mxu0 %vm552_vm1, %v1464_v15  ;;  %v1475_v19 = vld [vmem:[%s452_s17 + $0x10] sm:$0xff]   ;;  %v1474_v21 = vld [vmem:[%s452_s17] sm:$0xff]   ;;  %v1477_v22 = vld [vmem:[%s452_s17 + $0x18] sm:$0xff]   ;;  %s1239_s12 = sshll.u32 %s1702_s22, 6  ;;  %s1241_s18 = sshll.u32 %s1702_s22, 3 }
  0x1b   : > { %1369 = vmatmul.mubr.msk.bf16.vlgmr.msra.gmra.mrb[0].mxu0 %vm552_vm1, %v1466_v16  ;;  %v1476_v23 = vld [vmem:[%s452_s17 + $0x8] sm:$0xff]   ;;  %s465_s10 = sadd.s32 %s1239_s12, %s1238_s9  ;;  %s477_s19 = sadd.s32 %s1241_s18, %s1708_s21 }
  0x1c   : > { %1377 = vmatpush3.bf16.msra.mxu0 %v1467_v7  ;;  %1372 = vmatprep.mubr.msk.bf16.mxu0 %vm552_vm1, %v1470_v17  ;;  %s1240_s13 = sshll.u32 %s465_s10, 2  ;;  %s478_s30 = scalar_lea.vmem %s1689_s5, %s477_s19 }
  0x1d   : > { %1394 = vmatpush3.bf16.msra.mxu1 %v1468_v9  ;;  %1378 = vmatprep.subr.bf16.mxu0 %v1468_v9  ;;  %s467_s16 = scalar_lea.vmem %s1688_s4, %s1240_s13  ;;  %s488_s29 = scalar_lea.vmem %s1690_s6, %s477_s19 }
  0x1e   : > { %1415 = vmatprep.subr.msk.bf16.mxu1 %vm565_vm0, %v1473_v14 }
  0x20   : > { %1359 = vmatmul.mubr.msk.bf16.gmra.mrb[4].mxu1 %vm552_vm1, %v1471_v13  ;;  %1379 = vmatpush3.bf16.msra.mxu0 %v1468_v9 }
  0x21   : > { %1395 = vmatpush3.bf16.msra.mxu1 %v811_v18  ;;  %1386 = vmatprep.mubr.msk.bf16.mxu1 %vm552_vm1, %v1475_v19 }
  0x22   : > { %1414 = vmatprep.subr.msk.bf16.mxu0 %vm565_vm0, %v1473_v14 }
  0x23   : > { %1373 = vmatmul.mubr.msk.bf16.gmra.mrb[4].mxu0 %vm552_vm1, %v1472_v20 }
  0x24   : > { %1381 = vmatpush3.bf16.msra.mxu0 %v811_v18  ;;  %1382 = vmatprep.mubr.msk.bf16.mxu0 %vm552_vm1, %v1474_v21 }
  0x28   : > { %1387 = vmatmul.mubr.msk.bf16.vlgmr.msra.gmra.mrb[8].mxu1 %vm552_vm1, %v1477_v22 }
  0x2b   : > { %1383 = vmatmul.mubr.msk.bf16.vlgmr.msra.gmra.mrb[0].mxu0 %vm552_vm1, %v1476_v23 }
  0xeb   : > { %v1356_v24 = vpop.f32.mrb[0].mxu1 }
  0xec   : > { %v603_v25 = vpop.f32.mrb[1].mxu1 }
  0xed   : > { %v1357_v26 = vpop.f32.mrb[2].mxu1 }
  0xee   : > { %v606_v27 = vpop.f32.mrb[3].mxu1 }
  0xf3   : > { %v1360_v28 = vpop.f32.mrb[4].mxu1 }
  0xf4   : > { %v619_v29 = vpop.f32.mrb[5].mxu1 }
  0xf5   : > { %v1361_v30 = vpop.f32.mrb[6].mxu1 }
  0xf6   : > { %v622_v31 = vpop.f32.mrb[7].mxu1  ;;  %v1374_v32 = vpop.f32.mrb[4].mxu0 }
  0xf7   : > { %v743_v33 = vadd.f32 %v1374_v32, %v1360_v28  ;;  %v734_v34 = vpop.f32.mrb[5].mxu0 }
  0xf8   : > { %v735_v35 = vadd.f32 %v734_v34, %v619_v29  ;;  %v1375_v36 = vpop.f32.mrb[6].mxu0 }
  0xf9   : > { %v746_v38 = vadd.f32 %v1375_v36, %v1361_v30  ;;  %v737_v39 = vpop.f32.mrb[7].mxu0 }
  0xfa   : > { %v738_v42 = vadd.f32 %v737_v39, %v622_v31 }
  0xfb   : > { %v1388_v37 = vpop.f32.mrb[8].mxu1 }
  0xfc   : > { %v884_v40 = vadd.f32 %v1388_v37, %v743_v33  ;;  %v863_v41 = vpop.f32.mrb[9].mxu1 }
  0xfd   : > { %v882_v43 = vadd.f32 %v863_v41, %v735_v35  ;;  %v1389_v44 = vpop.f32.mrb[10].mxu1 }
  0xfe   : > { %v885_v45 = vadd.f32 %v1389_v44, %v746_v38  ;;  %v866_v46 = vpop.f32.mrb[11].mxu1  ;;  %v1384_v49 = vpop.f32.mrb[0].mxu0  ;;  %v946_v11 = vmul.f32 %v884_v40, %v884_v40 }
  0xff   : > { %v883_v47 = vadd.f32 %v866_v46, %v738_v42  ;;  %v1396_v51 = vadd.f32 %v1384_v49, %v1356_v24  ;;  %v847_v52 = vpop.f32.mrb[1].mxu0  ;;  %v944_v5 = vmul.f32 %v882_v43, %v882_v43 }
 0x100   : > { %v1322_v48 = vpack.c.bf16 %v885_v45, %v884_v40  ;;  %v1397_v53 = vadd.f32 %v847_v52, %v603_v25  ;;  %v1385_v54 = vpop.f32.mrb[2].mxu0  ;;  %v947_v14 = vmul.f32 %v885_v45, %v885_v45 }
 0x101   : > { %v1317_v50 = vpack.c.bf16 %v883_v47, %v882_v43  ;;  %v1398_v55 = vadd.f32 %v1385_v54, %v1357_v26  ;;  %v850_v56 = vpop.f32.mrb[3].mxu0  ;;  %v942_v63 = vmul.f32 %v1396_v51, %v1396_v51  ;;  %v945_v9 = vmul.f32 %v883_v47, %v883_v47 }
 0x102   : > { %1326 = vst [vmem:[%s467_s16 + $0x18] sm:$0xff] %v1322_v48   ;;  %v1399_v57 = vadd.f32 %v850_v56, %v606_v27  ;;  %v940_v59 = vmul.f32 %v1397_v53, %v1397_v53 }
 0x103   : > { %1325 = vst [vmem:[%s467_s16 + $0x10] sm:$0xff] %v1317_v50   ;;  %v1312_v58 = vpack.c.bf16 %v1398_v55, %v1396_v51  ;;  %v943_v2 = vmul.f32 %v1398_v55, %v1398_v55 }
 0x104   : > { %v1307_v60 = vpack.c.bf16 %v1399_v57, %v1397_v53  ;;  %v926_v61 = vadd.f32 %v1399_v57, %v1397_v53  ;;  %v941_v62 = vmul.f32 %v1399_v57, %v1399_v57 }
 0x105   : > { %1324 = vst [vmem:[%s467_s16 + $0x8] sm:$0xff] %v1312_v58  }
 0x106   : > { %1308 = vst [vmem:[%s467_s16] sm:$0xff] %v1307_v60   ;;  %v927_v0 = vadd.f32 %v1396_v51, %v926_v61  ;;  %v948_v1 = vadd.f32 %v941_v62, %v940_v59 }
 0x108   : > { %v949_v3 = vadd.f32 %v948_v1, %v942_v63  ;;  %v928_v4 = vadd.f32 %v1398_v55, %v927_v0 }
 0x10a   : > { %v929_v6 = vadd.f32 %v928_v4, %v882_v43  ;;  %v950_v7 = vadd.f32 %v949_v3, %v943_v2 }
 0x10c   : > { %v930_v8 = vadd.f32 %v929_v6, %v883_v47  ;;  %v951_v10 = vadd.f32 %v950_v7, %v944_v5 }
 0x10e   : > { %v931_v12 = vadd.f32 %v930_v8, %v884_v40  ;;  %v952_v13 = vadd.f32 %v951_v10, %v945_v9 }
 0x110   : > { %v932_v15 = vadd.f32 %v931_v12, %v885_v45  ;;  %v953_v16 = vadd.f32 %v952_v13, %v946_v11 }
 0x112   : > { %v933_v17 = vrot.slane %v932_v15, 4  ;;  %v954_v18 = vadd.f32 %v953_v16, %v947_v14 }
 0x114   : > { %v934_v19 = vadd.f32 %v933_v17, %v932_v15  ;;  %v955_v20 = vrot.slane %v954_v18, 4 }
 0x116   : > { %v935_v21 = vrot.slane %v934_v19, 2  ;;  %v956_v22 = vadd.f32 %v955_v20, %v954_v18 }
 0x118   : > { %v936_v23 = vadd.f32 %v935_v21, %v934_v19  ;;  %v957_v24 = vrot.slane %v956_v22, 2 }
 0x11a   : > { %v937_v25 = vrot.slane %v936_v23, 1  ;;  %v958_v26 = vadd.f32 %v957_v24, %v956_v22 }
 0x11c   : > { %v938_v27 = vadd.f32 %v937_v25, %v936_v23  ;;  %v959_v28 = vrot.slane %v958_v26, 1 }
 0x11e   : > { %939 = vst [vmem:[%s478_s30] sm:$0x1] %v938_v27  ;;  %v960_v29 = vadd.f32 %v959_v28, %v958_v26 }
 0x120   : > { %961 = vst [vmem:[%s488_s29] sm:$0x1] %v960_v29 }
 0x121 PF: > { %s17_s25 = sadd.s32 1, %s1516_s25   ;;  %s1691_s21 = smov %s1508_s23 }
 0x122   : > { %p14_p10 = scmp.ge.s32.totalorder %s17_s25, 18   ;;  %s1692_s22 = smov %s1512_s24 }
 0x123   : > { %s1693_s23 = smov %s1696_s26  ;;  %s1694_s24 = smov %s1700_s27 }
 0x124   :  { %16 = sbr.rel (!%p14_p10) target bundleno = 3 (0x3), region = 98 }

// kernel: conv3d_block.3
= control target key start
LH: loop header
LB: loop body
LE: loop exit
PB: predicated region body
PF: predicated region fallthrough
CT: control target
= control target key end

     0   :  { %s1995_s0 = inlined_call_operand.vmem [shape: bf16[1024,128], index: 0, kind: input, shape index: {}]   ;;  %s1996_s1 = inlined_call_operand.vmem [shape: f32[1,128], index: 1, kind: input, shape index: {}]   ;;  %s1997_s2 = inlined_call_operand.vmem [shape: f32[1,128], index: 2, kind: input, shape index: {}]   ;;  %s1998_s3 = inlined_call_operand.vmem [shape: f32[1024,128], index: 3, kind: output, shape index: {}]  }
   0x1   :  { %v803_v0 = vld [vmem:[%s1995_s0] sm:$0xff]   ;;  %v1058_v4 = vld [vmem:[%s1995_s0 + $0x8] sm:$0xff]   ;;  %v1059_v5 = vld [vmem:[%s1995_s0 + $0x10] sm:$0xff]  }
   0x2   :  { %v1149_v1 = vld [vmem:[%s1996_s1] ss:$0 sm:$0xff]  ;;  %v804_v2 = vunpack.c.l.bf16 %v803_v0  ;;  %v805_v3 = vunpack.c.h.bf16 %v803_v0  ;;  %v1060_v6 = vld [vmem:[%s1995_s0 + $0x18] sm:$0xff]   ;;  %v808_v8 = vunpack.c.l.bf16 %v1058_v4  ;;  %v809_v9 = vunpack.c.h.bf16 %v1058_v4  ;;  %v1062_v33 = vld [vmem:[%s1995_s0 + $0x28] sm:$0xff]  }
   0x3   :  { %v1163_v7 = vld [vmem:[%s1997_s2] ss:$0 sm:$0xff]  ;;  %v812_v10 = vunpack.c.l.bf16 %v1059_v5  ;;  %v813_v11 = vunpack.c.h.bf16 %v1059_v5  ;;  %v816_v14 = vunpack.c.l.bf16 %v1060_v6  ;;  %v817_v15 = vunpack.c.h.bf16 %v1060_v6  ;;  %v1063_v34 = vld [vmem:[%s1995_s0 + $0x30] sm:$0xff]   ;;  %v1064_v39 = vld [vmem:[%s1995_s0 + $0x38] sm:$0xff]  }
   0x4   :  { %v277_v12 = vmul.f32 %v804_v2, %v1149_v1  ;;  %v278_v13 = vmul.f32 %v805_v3, %v1149_v1  ;;  %v279_v16 = vmul.f32 %v808_v8, %v1149_v1  ;;  %v280_v17 = vmul.f32 %v809_v9, %v1149_v1  ;;  %v1061_v28 = vld [vmem:[%s1995_s0 + $0x20] sm:$0xff]   ;;  %v1066_v6 = vld [vmem:[%s1995_s0 + $0x48] sm:$0xff]   ;;  %v1067_v8 = vld [vmem:[%s1995_s0 + $0x50] sm:$0xff]  }
   0x5   :  { %v281_v18 = vmul.f32 %v812_v10, %v1149_v1  ;;  %v282_v19 = vmul.f32 %v813_v11, %v1149_v1  ;;  %v283_v22 = vmul.f32 %v816_v14, %v1149_v1  ;;  %v284_v23 = vmul.f32 %v817_v15, %v1149_v1  ;;  %v1065_v0 = vld [vmem:[%s1995_s0 + $0x40] sm:$0xff]  }
   0x6   :  { %v412_v20 = vadd.f32 %v1163_v7, %v277_v12  ;;  %v413_v21 = vadd.f32 %v1163_v7, %v278_v13  ;;  %v414_v24 = vadd.f32 %v1163_v7, %v279_v16  ;;  %v415_v25 = vadd.f32 %v1163_v7, %v280_v17  ;;  %v1068_v13 = vld [vmem:[%s1995_s0 + $0x58] sm:$0xff]  }
   0x7   :  { %v416_v26 = vadd.f32 %v1163_v7, %v281_v18  ;;  %v417_v27 = vadd.f32 %v1163_v7, %v282_v19  ;;  %v418_v31 = vadd.f32 %v1163_v7, %v283_v22  ;;  %v419_v32 = vadd.f32 %v1163_v7, %v284_v23 }
   0x8   :  { %v540_v29 = vmax.f32 %v412_v20, 0.0  ;;  %v541_v30 = vmax.f32 %v413_v21, 0.0  ;;  %v542_v35 = vmax.f32 %v414_v24, 0.0  ;;  %v543_v36 = vmax.f32 %v415_v25, 0.0 }
   0x9   :  { %v544_v37 = vmax.f32 %v416_v26, 0.0  ;;  %v545_v38 = vmax.f32 %v417_v27, 0.0  ;;  %v546_v40 = vmax.f32 %v418_v31, 0.0  ;;  %v547_v41 = vmax.f32 %v419_v32, 0.0 }
   0xa   :  { %668 = vst [vmem:[%s1998_s3] sm:$0xff] %v540_v29  ;;  %669 = vst [vmem:[%s1998_s3 + $0x8] sm:$0xff] %v541_v30  ;;  %v820_v42 = vunpack.c.l.bf16 %v1061_v28  ;;  %v821_v43 = vunpack.c.h.bf16 %v1061_v28  ;;  %v824_v44 = vunpack.c.l.bf16 %v1062_v33  ;;  %v825_v45 = vunpack.c.h.bf16 %v1062_v33 }
   0xb   :  { %670 = vst [vmem:[%s1998_s3 + $0x10] sm:$0xff] %v542_v35  ;;  %671 = vst [vmem:[%s1998_s3 + $0x18] sm:$0xff] %v543_v36  ;;  %v828_v46 = vunpack.c.l.bf16 %v1063_v34  ;;  %v829_v47 = vunpack.c.h.bf16 %v1063_v34  ;;  %v832_v50 = vunpack.c.l.bf16 %v1064_v39  ;;  %v833_v51 = vunpack.c.h.bf16 %v1064_v39 }
   0xc   :  { %672 = vst [vmem:[%s1998_s3 + $0x20] sm:$0xff] %v544_v37  ;;  %673 = vst [vmem:[%s1998_s3 + $0x28] sm:$0xff] %v545_v38  ;;  %v285_v48 = vmul.f32 %v820_v42, %v1149_v1  ;;  %v286_v49 = vmul.f32 %v821_v43, %v1149_v1  ;;  %v287_v52 = vmul.f32 %v824_v44, %v1149_v1  ;;  %v836_v16 = vunpack.c.l.bf16 %v1065_v0  ;;  %v1069_v38 = vld [vmem:[%s1995_s0 + $0x60] sm:$0xff]   ;;  %v1070_v43 = vld [vmem:[%s1995_s0 + $0x68] sm:$0xff]  }
   0xd   :  { %674 = vst [vmem:[%s1998_s3 + $0x30] sm:$0xff] %v546_v40  ;;  %675 = vst [vmem:[%s1998_s3 + $0x38] sm:$0xff] %v547_v41  ;;  %v288_v53 = vmul.f32 %v825_v45, %v1149_v1  ;;  %v289_v54 = vmul.f32 %v828_v46, %v1149_v1  ;;  %v290_v55 = vmul.f32 %v829_v47, %v1149_v1  ;;  %v837_v17 = vunpack.c.h.bf16 %v1065_v0  ;;  %v1071_v44 = vld [vmem:[%s1995_s0 + $0x70] sm:$0xff]  }
   0xe   :  { %v420_v56 = vadd.f32 %v1163_v7, %v285_v48  ;;  %v421_v57 = vadd.f32 %v1163_v7, %v286_v49  ;;  %v291_v58 = vmul.f32 %v832_v50, %v1149_v1  ;;  %v292_v59 = vmul.f32 %v833_v51, %v1149_v1  ;;  %v1072_v49 = vld [vmem:[%s1995_s0 + $0x78] sm:$0xff]  }
   0xf   :  { %v422_v60 = vadd.f32 %v1163_v7, %v287_v52  ;;  %v423_v61 = vadd.f32 %v1163_v7, %v288_v53  ;;  %v424_v62 = vadd.f32 %v1163_v7, %v289_v54  ;;  %v425_v63 = vadd.f32 %v1163_v7, %v290_v55 }
  0x10   :  { %v548_v2 = vmax.f32 %v420_v56, 0.0  ;;  %v549_v3 = vmax.f32 %v421_v57, 0.0  ;;  %v426_v4 = vadd.f32 %v1163_v7, %v291_v58  ;;  %v427_v5 = vadd.f32 %v1163_v7, %v292_v59 }
  0x11   :  { %v550_v9 = vmax.f32 %v422_v60, 0.0  ;;  %v551_v10 = vmax.f32 %v423_v61, 0.0  ;;  %v552_v11 = vmax.f32 %v424_v62, 0.0  ;;  %v553_v12 = vmax.f32 %v425_v63, 0.0 }
  0x12   :  { %676 = vst [vmem:[%s1998_s3 + $0x40] sm:$0xff] %v548_v2  ;;  %677 = vst [vmem:[%s1998_s3 + $0x48] sm:$0xff] %v549_v3  ;;  %v554_v14 = vmax.f32 %v426_v4, 0.0  ;;  %v555_v15 = vmax.f32 %v427_v5, 0.0  ;;  %v840_v18 = vunpack.c.l.bf16 %v1066_v6  ;;  %v841_v19 = vunpack.c.h.bf16 %v1066_v6 }
  0x13   :  { %678 = vst [vmem:[%s1998_s3 + $0x50] sm:$0xff] %v550_v9  ;;  %679 = vst [vmem:[%s1998_s3 + $0x58] sm:$0xff] %v551_v10  ;;  %v844_v20 = vunpack.c.l.bf16 %v1067_v8  ;;  %v845_v21 = vunpack.c.h.bf16 %v1067_v8  ;;  %v293_v22 = vmul.f32 %v836_v16, %v1149_v1  ;;  %v294_v23 = vmul.f32 %v837_v17, %v1149_v1  ;;  %v1074_v17 = vld [vmem:[%s1995_s0 + $0x88] sm:$0xff]  }
  0x14   :  { %680 = vst [vmem:[%s1998_s3 + $0x60] sm:$0xff] %v552_v11  ;;  %681 = vst [vmem:[%s1998_s3 + $0x68] sm:$0xff] %v553_v12  ;;  %v848_v24 = vunpack.c.l.bf16 %v1068_v13  ;;  %v849_v25 = vunpack.c.h.bf16 %v1068_v13  ;;  %v295_v26 = vmul.f32 %v840_v18, %v1149_v1  ;;  %v296_v27 = vmul.f32 %v841_v19, %v1149_v1  ;;  %v1073_v12 = vld [vmem:[%s1995_s0 + $0x80] sm:$0xff]   ;;  %v1075_v18 = vld [vmem:[%s1995_s0 + $0x90] sm:$0xff]  }
  0x15   :  { %682 = vst [vmem:[%s1998_s3 + $0x70] sm:$0xff] %v554_v14  ;;  %683 = vst [vmem:[%s1998_s3 + $0x78] sm:$0xff] %v555_v15  ;;  %v297_v28 = vmul.f32 %v844_v20, %v1149_v1  ;;  %v298_v29 = vmul.f32 %v845_v21, %v1149_v1  ;;  %v428_v30 = vadd.f32 %v1163_v7, %v293_v22  ;;  %v852_v52 = vunpack.c.l.bf16 %v1069_v38 }
  0x16   :  { %v429_v31 = vadd.f32 %v1163_v7, %v294_v23  ;;  %v299_v32 = vmul.f32 %v848_v24, %v1149_v1  ;;  %v300_v33 = vmul.f32 %v849_v25, %v1149_v1  ;;  %v430_v34 = vadd.f32 %v1163_v7, %v295_v26  ;;  %v1076_v23 = vld [vmem:[%s1995_s0 + $0x98] sm:$0xff]  }
  0x17   :  { %v431_v35 = vadd.f32 %v1163_v7, %v296_v27  ;;  %v432_v36 = vadd.f32 %v1163_v7, %v297_v28  ;;  %v433_v37 = vadd.f32 %v1163_v7, %v298_v29  ;;  %v556_v39 = vmax.f32 %v428_v30, 0.0 }
  0x18   :  { %v557_v40 = vmax.f32 %v429_v31, 0.0  ;;  %v434_v41 = vadd.f32 %v1163_v7, %v299_v32  ;;  %v435_v42 = vadd.f32 %v1163_v7, %v300_v33  ;;  %v558_v45 = vmax.f32 %v430_v34, 0.0 }
  0x19   :  { %v559_v46 = vmax.f32 %v431_v35, 0.0  ;;  %v560_v47 = vmax.f32 %v432_v36, 0.0  ;;  %v561_v48 = vmax.f32 %v433_v37, 0.0  ;;  %684 = vst [vmem:[%s1998_s3 + $0x80] sm:$0xff] %v556_v39  ;;  %v853_v53 = vunpack.c.h.bf16 %v1069_v38 }
  0x1a   :  { %685 = vst [vmem:[%s1998_s3 + $0x88] sm:$0xff] %v557_v40  ;;  %v562_v50 = vmax.f32 %v434_v41, 0.0  ;;  %v563_v51 = vmax.f32 %v435_v42, 0.0  ;;  %686 = vst [vmem:[%s1998_s3 + $0x90] sm:$0xff] %v558_v45  ;;  %v856_v54 = vunpack.c.l.bf16 %v1070_v43  ;;  %v857_v55 = vunpack.c.h.bf16 %v1070_v43 }
  0x1b   :  { %687 = vst [vmem:[%s1998_s3 + $0x98] sm:$0xff] %v559_v46  ;;  %688 = vst [vmem:[%s1998_s3 + $0xa0] sm:$0xff] %v560_v47  ;;  %v860_v56 = vunpack.c.l.bf16 %v1071_v44  ;;  %v861_v57 = vunpack.c.h.bf16 %v1071_v44  ;;  %v301_v58 = vmul.f32 %v852_v52, %v1149_v1  ;;  %v302_v59 = vmul.f32 %v853_v53, %v1149_v1  ;;  %v1078_v53 = vld [vmem:[%s1995_s0 + $0xa8] sm:$0xff]  }
  0x1c   :  { %689 = vst [vmem:[%s1998_s3 + $0xa8] sm:$0xff] %v561_v48  ;;  %690 = vst [vmem:[%s1998_s3 + $0xb0] sm:$0xff] %v562_v50  ;;  %v864_v60 = vunpack.c.l.bf16 %v1072_v49  ;;  %v865_v61 = vunpack.c.h.bf16 %v1072_v49  ;;  %v303_v62 = vmul.f32 %v856_v54, %v1149_v1  ;;  %v304_v63 = vmul.f32 %v857_v55, %v1149_v1  ;;  %v1077_v48 = vld [vmem:[%s1995_s0 + $0xa0] sm:$0xff]   ;;  %v1079_v54 = vld [vmem:[%s1995_s0 + $0xb0] sm:$0xff]  }
  0x1d   :  { %691 = vst [vmem:[%s1998_s3 + $0xb8] sm:$0xff] %v563_v51  ;;  %v305_v0 = vmul.f32 %v860_v56, %v1149_v1  ;;  %v306_v2 = vmul.f32 %v861_v57, %v1149_v1  ;;  %v436_v3 = vadd.f32 %v1163_v7, %v301_v58  ;;  %v437_v4 = vadd.f32 %v1163_v7, %v302_v59  ;;  %v1080_v59 = vld [vmem:[%s1995_s0 + $0xb8] sm:$0xff]  }
  0x1e   :  { %v307_v5 = vmul.f32 %v864_v60, %v1149_v1  ;;  %v308_v6 = vmul.f32 %v865_v61, %v1149_v1  ;;  %v438_v8 = vadd.f32 %v1163_v7, %v303_v62  ;;  %v439_v9 = vadd.f32 %v1163_v7, %v304_v63 }
  0x1f   :  { %v440_v10 = vadd.f32 %v1163_v7, %v305_v0  ;;  %v441_v11 = vadd.f32 %v1163_v7, %v306_v2  ;;  %v564_v13 = vmax.f32 %v436_v3, 0.0  ;;  %v565_v14 = vmax.f32 %v437_v4, 0.0 }
  0x20   :  { %v442_v15 = vadd.f32 %v1163_v7, %v307_v5  ;;  %v443_v16 = vadd.f32 %v1163_v7, %v308_v6  ;;  %v566_v19 = vmax.f32 %v438_v8, 0.0  ;;  %v567_v20 = vmax.f32 %v439_v9, 0.0 }
  0x21   :  { %v568_v21 = vmax.f32 %v440_v10, 0.0  ;;  %v569_v22 = vmax.f32 %v441_v11, 0.0  ;;  %692 = vst [vmem:[%s1998_s3 + $0xc0] sm:$0xff] %v564_v13  ;;  %693 = vst [vmem:[%s1998_s3 + $0xc8] sm:$0xff] %v565_v14  ;;  %v868_v26 = vunpack.c.l.bf16 %v1073_v12  ;;  %v869_v27 = vunpack.c.h.bf16 %v1073_v12 }
  0x22   :  { %v570_v24 = vmax.f32 %v442_v15, 0.0  ;;  %v571_v25 = vmax.f32 %v443_v16, 0.0  ;;  %694 = vst [vmem:[%s1998_s3 + $0xd0] sm:$0xff] %v566_v19  ;;  %695 = vst [vmem:[%s1998_s3 + $0xd8] sm:$0xff] %v567_v20  ;;  %v872_v28 = vunpack.c.l.bf16 %v1074_v17  ;;  %v873_v29 = vunpack.c.h.bf16 %v1074_v17 }
  0x23   :  { %696 = vst [vmem:[%s1998_s3 + $0xe0] sm:$0xff] %v568_v21  ;;  %697 = vst [vmem:[%s1998_s3 + $0xe8] sm:$0xff] %v569_v22  ;;  %v876_v30 = vunpack.c.l.bf16 %v1075_v18  ;;  %v877_v31 = vunpack.c.h.bf16 %v1075_v18  ;;  %v309_v32 = vmul.f32 %v868_v26, %v1149_v1  ;;  %v310_v33 = vmul.f32 %v869_v27, %v1149_v1  ;;  %v1081_v22 = vld [vmem:[%s1995_s0 + $0xc0] sm:$0xff]   ;;  %v1082_v27 = vld [vmem:[%s1995_s0 + $0xc8] sm:$0xff]  }
  0x24   :  { %698 = vst [vmem:[%s1998_s3 + $0xf0] sm:$0xff] %v570_v24  ;;  %699 = vst [vmem:[%s1998_s3 + $0xf8] sm:$0xff] %v571_v25  ;;  %v880_v34 = vunpack.c.l.bf16 %v1076_v23  ;;  %v881_v35 = vunpack.c.h.bf16 %v1076_v23  ;;  %v311_v36 = vmul.f32 %v872_v28, %v1149_v1  ;;  %v312_v37 = vmul.f32 %v873_v29, %v1149_v1  ;;  %v1083_v28 = vld [vmem:[%s1995_s0 + $0xd0] sm:$0xff]  }
  0x25   :  { %v313_v38 = vmul.f32 %v876_v30, %v1149_v1  ;;  %v314_v39 = vmul.f32 %v877_v31, %v1149_v1  ;;  %v444_v40 = vadd.f32 %v1163_v7, %v309_v32  ;;  %v445_v41 = vadd.f32 %v1163_v7, %v310_v33  ;;  %v1084_v33 = vld [vmem:[%s1995_s0 + $0xd8] sm:$0xff]  }
  0x26   :  { %v315_v42 = vmul.f32 %v880_v34, %v1149_v1  ;;  %v316_v43 = vmul.f32 %v881_v35, %v1149_v1  ;;  %v446_v44 = vadd.f32 %v1163_v7, %v311_v36  ;;  %v447_v45 = vadd.f32 %v1163_v7, %v312_v37 }
  0x27   :  { %v448_v46 = vadd.f32 %v1163_v7, %v313_v38  ;;  %v449_v47 = vadd.f32 %v1163_v7, %v314_v39  ;;  %v572_v49 = vmax.f32 %v444_v40, 0.0  ;;  %v573_v50 = vmax.f32 %v445_v41, 0.0 }
  0x28   :  { %v450_v51 = vadd.f32 %v1163_v7, %v315_v42  ;;  %v451_v52 = vadd.f32 %v1163_v7, %v316_v43  ;;  %v574_v55 = vmax.f32 %v446_v44, 0.0  ;;  %v575_v56 = vmax.f32 %v447_v45, 0.0 }
  0x29   :  { %v576_v57 = vmax.f32 %v448_v46, 0.0  ;;  %v577_v58 = vmax.f32 %v449_v47, 0.0  ;;  %700 = vst [vmem:[%s1998_s3 + $0x100] sm:$0xff] %v572_v49  ;;  %701 = vst [vmem:[%s1998_s3 + $0x108] sm:$0xff] %v573_v50  ;;  %v884_v62 = vunpack.c.l.bf16 %v1077_v48  ;;  %v885_v63 = vunpack.c.h.bf16 %v1077_v48 }
  0x2a   :  { %v578_v60 = vmax.f32 %v450_v51, 0.0  ;;  %v579_v61 = vmax.f32 %v451_v52, 0.0  ;;  %702 = vst [vmem:[%s1998_s3 + $0x110] sm:$0xff] %v574_v55  ;;  %703 = vst [vmem:[%s1998_s3 + $0x118] sm:$0xff] %v575_v56  ;;  %v888_v0 = vunpack.c.l.bf16 %v1078_v53  ;;  %v889_v2 = vunpack.c.h.bf16 %v1078_v53 }
  0x2b   :  { %704 = vst [vmem:[%s1998_s3 + $0x120] sm:$0xff] %v576_v57  ;;  %705 = vst [vmem:[%s1998_s3 + $0x128] sm:$0xff] %v577_v58  ;;  %v892_v3 = vunpack.c.l.bf16 %v1079_v54  ;;  %v893_v4 = vunpack.c.h.bf16 %v1079_v54  ;;  %v317_v5 = vmul.f32 %v884_v62, %v1149_v1  ;;  %v318_v6 = vmul.f32 %v885_v63, %v1149_v1  ;;  %v1085_v58 = vld [vmem:[%s1995_s0 + $0xe0] sm:$0xff]   ;;  %v1086_v63 = vld [vmem:[%s1995_s0 + $0xe8] sm:$0xff]  }
  0x2c   :  { %706 = vst [vmem:[%s1998_s3 + $0x130] sm:$0xff] %v578_v60  ;;  %707 = vst [vmem:[%s1998_s3 + $0x138] sm:$0xff] %v579_v61  ;;  %v896_v8 = vunpack.c.l.bf16 %v1080_v59  ;;  %v897_v9 = vunpack.c.h.bf16 %v1080_v59  ;;  %v319_v10 = vmul.f32 %v888_v0, %v1149_v1  ;;  %v320_v11 = vmul.f32 %v889_v2, %v1149_v1  ;;  %v1087_v0 = vld [vmem:[%s1995_s0 + $0xf0] sm:$0xff]  }
  0x2d   :  { %v321_v12 = vmul.f32 %v892_v3, %v1149_v1  ;;  %v322_v13 = vmul.f32 %v893_v4, %v1149_v1  ;;  %v452_v14 = vadd.f32 %v1163_v7, %v317_v5  ;;  %v453_v15 = vadd.f32 %v1163_v7, %v318_v6  ;;  %v1088_v6 = vld [vmem:[%s1995_s0 + $0xf8] sm:$0xff]  }
  0x2e   :  { %v323_v16 = vmul.f32 %v896_v8, %v1149_v1  ;;  %v324_v17 = vmul.f32 %v897_v9, %v1149_v1  ;;  %v454_v18 = vadd.f32 %v1163_v7, %v319_v10  ;;  %v455_v19 = vadd.f32 %v1163_v7, %v320_v11 }
  0x2f   :  { %v456_v20 = vadd.f32 %v1163_v7, %v321_v12  ;;  %v457_v21 = vadd.f32 %v1163_v7, %v322_v13  ;;  %v580_v23 = vmax.f32 %v452_v14, 0.0  ;;  %v581_v24 = vmax.f32 %v453_v15, 0.0 }
  0x30   :  { %v458_v25 = vadd.f32 %v1163_v7, %v323_v16  ;;  %v459_v26 = vadd.f32 %v1163_v7, %v324_v17  ;;  %v582_v29 = vmax.f32 %v454_v18, 0.0  ;;  %v583_v30 = vmax.f32 %v455_v19, 0.0 }
  0x31   :  { %v584_v31 = vmax.f32 %v456_v20, 0.0  ;;  %v585_v32 = vmax.f32 %v457_v21, 0.0  ;;  %708 = vst [vmem:[%s1998_s3 + $0x140] sm:$0xff] %v580_v23  ;;  %709 = vst [vmem:[%s1998_s3 + $0x148] sm:$0xff] %v581_v24  ;;  %v900_v36 = vunpack.c.l.bf16 %v1081_v22  ;;  %v901_v37 = vunpack.c.h.bf16 %v1081_v22 }
  0x32   :  { %v586_v34 = vmax.f32 %v458_v25, 0.0  ;;  %v587_v35 = vmax.f32 %v459_v26, 0.0  ;;  %710 = vst [vmem:[%s1998_s3 + $0x150] sm:$0xff] %v582_v29  ;;  %711 = vst [vmem:[%s1998_s3 + $0x158] sm:$0xff] %v583_v30  ;;  %v904_v38 = vunpack.c.l.bf16 %v1082_v27  ;;  %v905_v39 = vunpack.c.h.bf16 %v1082_v27 }
  0x33   :  { %712 = vst [vmem:[%s1998_s3 + $0x160] sm:$0xff] %v584_v31  ;;  %713 = vst [vmem:[%s1998_s3 + $0x168] sm:$0xff] %v585_v32  ;;  %v908_v40 = vunpack.c.l.bf16 %v1083_v28  ;;  %v909_v41 = vunpack.c.h.bf16 %v1083_v28  ;;  %v325_v42 = vmul.f32 %v900_v36, %v1149_v1  ;;  %v326_v43 = vmul.f32 %v901_v37, %v1149_v1  ;;  %v1089_v32 = vld [vmem:[%s1995_s0 + $0x100] sm:$0xff]   ;;  %v1090_v37 = vld [vmem:[%s1995_s0 + $0x108] sm:$0xff]  }
  0x34   :  { %714 = vst [vmem:[%s1998_s3 + $0x170] sm:$0xff] %v586_v34  ;;  %715 = vst [vmem:[%s1998_s3 + $0x178] sm:$0xff] %v587_v35  ;;  %v912_v44 = vunpack.c.l.bf16 %v1084_v33  ;;  %v913_v45 = vunpack.c.h.bf16 %v1084_v33  ;;  %v327_v46 = vmul.f32 %v904_v38, %v1149_v1  ;;  %v328_v47 = vmul.f32 %v905_v39, %v1149_v1  ;;  %v1091_v38 = vld [vmem:[%s1995_s0 + $0x110] sm:$0xff]  }
  0x35   :  { %v329_v48 = vmul.f32 %v908_v40, %v1149_v1  ;;  %v330_v49 = vmul.f32 %v909_v41, %v1149_v1  ;;  %v460_v50 = vadd.f32 %v1163_v7, %v325_v42  ;;  %v461_v51 = vadd.f32 %v1163_v7, %v326_v43  ;;  %v1092_v43 = vld [vmem:[%s1995_s0 + $0x118] sm:$0xff]  }
  0x36   :  { %v331_v52 = vmul.f32 %v912_v44, %v1149_v1  ;;  %v332_v53 = vmul.f32 %v913_v45, %v1149_v1  ;;  %v462_v54 = vadd.f32 %v1163_v7, %v327_v46  ;;  %v463_v55 = vadd.f32 %v1163_v7, %v328_v47 }
  0x37   :  { %v464_v56 = vadd.f32 %v1163_v7, %v329_v48  ;;  %v465_v57 = vadd.f32 %v1163_v7, %v330_v49  ;;  %v588_v59 = vmax.f32 %v460_v50, 0.0  ;;  %v589_v60 = vmax.f32 %v461_v51, 0.0 }
  0x38   :  { %v466_v61 = vadd.f32 %v1163_v7, %v331_v52  ;;  %v467_v62 = vadd.f32 %v1163_v7, %v332_v53  ;;  %v590_v2 = vmax.f32 %v462_v54, 0.0  ;;  %v591_v3 = vmax.f32 %v463_v55, 0.0 }
  0x39   :  { %v592_v4 = vmax.f32 %v464_v56, 0.0  ;;  %v593_v5 = vmax.f32 %v465_v57, 0.0  ;;  %716 = vst [vmem:[%s1998_s3 + $0x180] sm:$0xff] %v588_v59  ;;  %717 = vst [vmem:[%s1998_s3 + $0x188] sm:$0xff] %v589_v60  ;;  %v916_v10 = vunpack.c.l.bf16 %v1085_v58  ;;  %v917_v11 = vunpack.c.h.bf16 %v1085_v58 }
  0x3a   :  { %v594_v8 = vmax.f32 %v466_v61, 0.0  ;;  %v595_v9 = vmax.f32 %v467_v62, 0.0  ;;  %718 = vst [vmem:[%s1998_s3 + $0x190] sm:$0xff] %v590_v2  ;;  %719 = vst [vmem:[%s1998_s3 + $0x198] sm:$0xff] %v591_v3  ;;  %v920_v12 = vunpack.c.l.bf16 %v1086_v63  ;;  %v921_v13 = vunpack.c.h.bf16 %v1086_v63 }
  0x3b   :  { %720 = vst [vmem:[%s1998_s3 + $0x1a0] sm:$0xff] %v592_v4  ;;  %721 = vst [vmem:[%s1998_s3 + $0x1a8] sm:$0xff] %v593_v5  ;;  %v924_v14 = vunpack.c.l.bf16 %v1087_v0  ;;  %v925_v15 = vunpack.c.h.bf16 %v1087_v0  ;;  %v333_v16 = vmul.f32 %v916_v10, %v1149_v1  ;;  %v334_v17 = vmul.f32 %v917_v11, %v1149_v1  ;;  %v1093_v5 = vld [vmem:[%s1995_s0 + $0x120] sm:$0xff]   ;;  %v1094_v11 = vld [vmem:[%s1995_s0 + $0x128] sm:$0xff]  }
  0x3c   :  { %722 = vst [vmem:[%s1998_s3 + $0x1b0] sm:$0xff] %v594_v8  ;;  %723 = vst [vmem:[%s1998_s3 + $0x1b8] sm:$0xff] %v595_v9  ;;  %v928_v18 = vunpack.c.l.bf16 %v1088_v6  ;;  %v929_v19 = vunpack.c.h.bf16 %v1088_v6  ;;  %v335_v20 = vmul.f32 %v920_v12, %v1149_v1  ;;  %v336_v21 = vmul.f32 %v921_v13, %v1149_v1  ;;  %v1095_v12 = vld [vmem:[%s1995_s0 + $0x130] sm:$0xff]  }
  0x3d   :  { %v337_v22 = vmul.f32 %v924_v14, %v1149_v1  ;;  %v338_v23 = vmul.f32 %v925_v15, %v1149_v1  ;;  %v468_v24 = vadd.f32 %v1163_v7, %v333_v16  ;;  %v469_v25 = vadd.f32 %v1163_v7, %v334_v17  ;;  %v1096_v17 = vld [vmem:[%s1995_s0 + $0x138] sm:$0xff]  }
  0x3e   :  { %v339_v26 = vmul.f32 %v928_v18, %v1149_v1  ;;  %v340_v27 = vmul.f32 %v929_v19, %v1149_v1  ;;  %v470_v28 = vadd.f32 %v1163_v7, %v335_v20  ;;  %v471_v29 = vadd.f32 %v1163_v7, %v336_v21 }
  0x3f   :  { %v472_v30 = vadd.f32 %v1163_v7, %v337_v22  ;;  %v473_v31 = vadd.f32 %v1163_v7, %v338_v23  ;;  %v596_v33 = vmax.f32 %v468_v24, 0.0  ;;  %v597_v34 = vmax.f32 %v469_v25, 0.0 }
  0x40   :  { %v474_v35 = vadd.f32 %v1163_v7, %v339_v26  ;;  %v475_v36 = vadd.f32 %v1163_v7, %v340_v27  ;;  %v598_v39 = vmax.f32 %v470_v28, 0.0  ;;  %v599_v40 = vmax.f32 %v471_v29, 0.0 }
  0x41   :  { %v600_v41 = vmax.f32 %v472_v30, 0.0  ;;  %v601_v42 = vmax.f32 %v473_v31, 0.0  ;;  %724 = vst [vmem:[%s1998_s3 + $0x1c0] sm:$0xff] %v596_v33  ;;  %725 = vst [vmem:[%s1998_s3 + $0x1c8] sm:$0xff] %v597_v34  ;;  %v932_v46 = vunpack.c.l.bf16 %v1089_v32  ;;  %v933_v47 = vunpack.c.h.bf16 %v1089_v32 }
  0x42   :  { %v602_v44 = vmax.f32 %v474_v35, 0.0  ;;  %v603_v45 = vmax.f32 %v475_v36, 0.0  ;;  %726 = vst [vmem:[%s1998_s3 + $0x1d0] sm:$0xff] %v598_v39  ;;  %727 = vst [vmem:[%s1998_s3 + $0x1d8] sm:$0xff] %v599_v40  ;;  %v936_v48 = vunpack.c.l.bf16 %v1090_v37  ;;  %v937_v49 = vunpack.c.h.bf16 %v1090_v37 }
  0x43   :  { %728 = vst [vmem:[%s1998_s3 + $0x1e0] sm:$0xff] %v600_v41  ;;  %729 = vst [vmem:[%s1998_s3 + $0x1e8] sm:$0xff] %v601_v42  ;;  %v940_v50 = vunpack.c.l.bf16 %v1091_v38  ;;  %v941_v51 = vunpack.c.h.bf16 %v1091_v38  ;;  %v341_v52 = vmul.f32 %v932_v46, %v1149_v1  ;;  %v342_v53 = vmul.f32 %v933_v47, %v1149_v1  ;;  %v1097_v42 = vld [vmem:[%s1995_s0 + $0x140] sm:$0xff]   ;;  %v1098_v47 = vld [vmem:[%s1995_s0 + $0x148] sm:$0xff]  }
  0x44   :  { %730 = vst [vmem:[%s1998_s3 + $0x1f0] sm:$0xff] %v602_v44  ;;  %731 = vst [vmem:[%s1998_s3 + $0x1f8] sm:$0xff] %v603_v45  ;;  %v944_v54 = vunpack.c.l.bf16 %v1092_v43  ;;  %v945_v55 = vunpack.c.h.bf16 %v1092_v43  ;;  %v343_v56 = vmul.f32 %v936_v48, %v1149_v1  ;;  %v344_v57 = vmul.f32 %v937_v49, %v1149_v1  ;;  %v1099_v48 = vld [vmem:[%s1995_s0 + $0x150] sm:$0xff]  }
  0x45   :  { %v345_v58 = vmul.f32 %v940_v50, %v1149_v1  ;;  %v346_v59 = vmul.f32 %v941_v51, %v1149_v1  ;;  %v476_v60 = vadd.f32 %v1163_v7, %v341_v52  ;;  %v477_v61 = vadd.f32 %v1163_v7, %v342_v53  ;;  %v1100_v53 = vld [vmem:[%s1995_s0 + $0x158] sm:$0xff]  }
  0x46   :  { %v347_v62 = vmul.f32 %v944_v54, %v1149_v1  ;;  %v348_v63 = vmul.f32 %v945_v55, %v1149_v1  ;;  %v478_v0 = vadd.f32 %v1163_v7, %v343_v56  ;;  %v479_v2 = vadd.f32 %v1163_v7, %v344_v57 }
  0x47   :  { %v480_v3 = vadd.f32 %v1163_v7, %v345_v58  ;;  %v481_v4 = vadd.f32 %v1163_v7, %v346_v59  ;;  %v604_v6 = vmax.f32 %v476_v60, 0.0  ;;  %v605_v8 = vmax.f32 %v477_v61, 0.0 }
  0x48   :  { %v482_v9 = vadd.f32 %v1163_v7, %v347_v62  ;;  %v483_v10 = vadd.f32 %v1163_v7, %v348_v63  ;;  %v606_v13 = vmax.f32 %v478_v0, 0.0  ;;  %v607_v14 = vmax.f32 %v479_v2, 0.0 }
  0x49   :  { %v608_v15 = vmax.f32 %v480_v3, 0.0  ;;  %v609_v16 = vmax.f32 %v481_v4, 0.0  ;;  %732 = vst [vmem:[%s1998_s3 + $0x200] sm:$0xff] %v604_v6  ;;  %733 = vst [vmem:[%s1998_s3 + $0x208] sm:$0xff] %v605_v8  ;;  %v948_v20 = vunpack.c.l.bf16 %v1093_v5  ;;  %v949_v21 = vunpack.c.h.bf16 %v1093_v5 }
  0x4a   :  { %v610_v18 = vmax.f32 %v482_v9, 0.0  ;;  %v611_v19 = vmax.f32 %v483_v10, 0.0  ;;  %734 = vst [vmem:[%s1998_s3 + $0x210] sm:$0xff] %v606_v13  ;;  %735 = vst [vmem:[%s1998_s3 + $0x218] sm:$0xff] %v607_v14  ;;  %v952_v22 = vunpack.c.l.bf16 %v1094_v11  ;;  %v953_v23 = vunpack.c.h.bf16 %v1094_v11 }
  0x4b   :  { %736 = vst [vmem:[%s1998_s3 + $0x220] sm:$0xff] %v608_v15  ;;  %737 = vst [vmem:[%s1998_s3 + $0x228] sm:$0xff] %v609_v16  ;;  %v956_v24 = vunpack.c.l.bf16 %v1095_v12  ;;  %v957_v25 = vunpack.c.h.bf16 %v1095_v12  ;;  %v349_v26 = vmul.f32 %v948_v20, %v1149_v1  ;;  %v350_v27 = vmul.f32 %v949_v21, %v1149_v1  ;;  %v1101_v16 = vld [vmem:[%s1995_s0 + $0x160] sm:$0xff]   ;;  %v1102_v21 = vld [vmem:[%s1995_s0 + $0x168] sm:$0xff]  }
  0x4c   :  { %738 = vst [vmem:[%s1998_s3 + $0x230] sm:$0xff] %v610_v18  ;;  %739 = vst [vmem:[%s1998_s3 + $0x238] sm:$0xff] %v611_v19  ;;  %v960_v28 = vunpack.c.l.bf16 %v1096_v17  ;;  %v961_v29 = vunpack.c.h.bf16 %v1096_v17  ;;  %v351_v30 = vmul.f32 %v952_v22, %v1149_v1  ;;  %v352_v31 = vmul.f32 %v953_v23, %v1149_v1  ;;  %v1103_v22 = vld [vmem:[%s1995_s0 + $0x170] sm:$0xff]  }
  0x4d   :  { %v353_v32 = vmul.f32 %v956_v24, %v1149_v1  ;;  %v354_v33 = vmul.f32 %v957_v25, %v1149_v1  ;;  %v484_v34 = vadd.f32 %v1163_v7, %v349_v26  ;;  %v485_v35 = vadd.f32 %v1163_v7, %v350_v27  ;;  %v1104_v27 = vld [vmem:[%s1995_s0 + $0x178] sm:$0xff]  }
  0x4e   :  { %v355_v36 = vmul.f32 %v960_v28, %v1149_v1  ;;  %v356_v37 = vmul.f32 %v961_v29, %v1149_v1  ;;  %v486_v38 = vadd.f32 %v1163_v7, %v351_v30  ;;  %v487_v39 = vadd.f32 %v1163_v7, %v352_v31 }
  0x4f   :  { %v488_v40 = vadd.f32 %v1163_v7, %v353_v32  ;;  %v489_v41 = vadd.f32 %v1163_v7, %v354_v33  ;;  %v612_v43 = vmax.f32 %v484_v34, 0.0  ;;  %v613_v44 = vmax.f32 %v485_v35, 0.0 }
  0x50   :  { %v490_v45 = vadd.f32 %v1163_v7, %v355_v36  ;;  %v491_v46 = vadd.f32 %v1163_v7, %v356_v37  ;;  %v614_v49 = vmax.f32 %v486_v38, 0.0  ;;  %v615_v50 = vmax.f32 %v487_v39, 0.0 }
  0x51   :  { %v616_v51 = vmax.f32 %v488_v40, 0.0  ;;  %v617_v52 = vmax.f32 %v489_v41, 0.0  ;;  %740 = vst [vmem:[%s1998_s3 + $0x240] sm:$0xff] %v612_v43  ;;  %741 = vst [vmem:[%s1998_s3 + $0x248] sm:$0xff] %v613_v44  ;;  %v964_v56 = vunpack.c.l.bf16 %v1097_v42  ;;  %v965_v57 = vunpack.c.h.bf16 %v1097_v42 }
  0x52   :  { %v618_v54 = vmax.f32 %v490_v45, 0.0  ;;  %v619_v55 = vmax.f32 %v491_v46, 0.0  ;;  %742 = vst [vmem:[%s1998_s3 + $0x250] sm:$0xff] %v614_v49  ;;  %743 = vst [vmem:[%s1998_s3 + $0x258] sm:$0xff] %v615_v50  ;;  %v968_v58 = vunpack.c.l.bf16 %v1098_v47  ;;  %v969_v59 = vunpack.c.h.bf16 %v1098_v47 }
  0x53   :  { %744 = vst [vmem:[%s1998_s3 + $0x260] sm:$0xff] %v616_v51  ;;  %745 = vst [vmem:[%s1998_s3 + $0x268] sm:$0xff] %v617_v52  ;;  %v972_v60 = vunpack.c.l.bf16 %v1099_v48  ;;  %v973_v61 = vunpack.c.h.bf16 %v1099_v48  ;;  %v357_v62 = vmul.f32 %v964_v56, %v1149_v1  ;;  %v358_v63 = vmul.f32 %v965_v57, %v1149_v1  ;;  %v1105_v52 = vld [vmem:[%s1995_s0 + $0x180] sm:$0xff]   ;;  %v1107_v57 = vld [vmem:[%s1995_s0 + $0x190] sm:$0xff]  }
  0x54   :  { %746 = vst [vmem:[%s1998_s3 + $0x270] sm:$0xff] %v618_v54  ;;  %747 = vst [vmem:[%s1998_s3 + $0x278] sm:$0xff] %v619_v55  ;;  %v976_v0 = vunpack.c.l.bf16 %v1100_v53  ;;  %v977_v2 = vunpack.c.h.bf16 %v1100_v53  ;;  %v359_v3 = vmul.f32 %v968_v58, %v1149_v1  ;;  %v360_v4 = vmul.f32 %v969_v59, %v1149_v1 }
  0x55   :  { %v361_v5 = vmul.f32 %v972_v60, %v1149_v1  ;;  %v362_v6 = vmul.f32 %v973_v61, %v1149_v1  ;;  %v492_v8 = vadd.f32 %v1163_v7, %v357_v62  ;;  %v493_v9 = vadd.f32 %v1163_v7, %v358_v63  ;;  %v1108_v62 = vld [vmem:[%s1995_s0 + $0x198] sm:$0xff]  }
  0x56   :  { %v363_v10 = vmul.f32 %v976_v0, %v1149_v1  ;;  %v364_v11 = vmul.f32 %v977_v2, %v1149_v1  ;;  %v494_v12 = vadd.f32 %v1163_v7, %v359_v3  ;;  %v495_v13 = vadd.f32 %v1163_v7, %v360_v4 }
  0x57   :  { %v496_v14 = vadd.f32 %v1163_v7, %v361_v5  ;;  %v497_v15 = vadd.f32 %v1163_v7, %v362_v6  ;;  %v620_v17 = vmax.f32 %v492_v8, 0.0  ;;  %v621_v18 = vmax.f32 %v493_v9, 0.0  ;;  %v1792_v8 = vld [vmem:[%s1996_s1] ss:$0 sm:$0xff] }
  0x58   :  { %v498_v19 = vadd.f32 %v1163_v7, %v363_v10  ;;  %v499_v20 = vadd.f32 %v1163_v7, %v364_v11  ;;  %v622_v23 = vmax.f32 %v494_v12, 0.0  ;;  %v623_v24 = vmax.f32 %v495_v13, 0.0 }
  0x59   :  { %v624_v25 = vmax.f32 %v496_v14, 0.0  ;;  %v625_v26 = vmax.f32 %v497_v15, 0.0  ;;  %748 = vst [vmem:[%s1998_s3 + $0x280] sm:$0xff] %v620_v17  ;;  %749 = vst [vmem:[%s1998_s3 + $0x288] sm:$0xff] %v621_v18  ;;  %v980_v30 = vunpack.c.l.bf16 %v1101_v16  ;;  %v981_v31 = vunpack.c.h.bf16 %v1101_v16  ;;  %v1803_v17 = vld [vmem:[%s1997_s2] ss:$0 sm:$0xff] }
  0x5a   :  { %v626_v28 = vmax.f32 %v498_v19, 0.0  ;;  %v627_v29 = vmax.f32 %v499_v20, 0.0  ;;  %750 = vst [vmem:[%s1998_s3 + $0x290] sm:$0xff] %v622_v23  ;;  %751 = vst [vmem:[%s1998_s3 + $0x298] sm:$0xff] %v623_v24  ;;  %v984_v32 = vunpack.c.l.bf16 %v1102_v21  ;;  %v985_v33 = vunpack.c.h.bf16 %v1102_v21 }
  0x5b   :  { %752 = vst [vmem:[%s1998_s3 + $0x2a0] sm:$0xff] %v624_v25  ;;  %753 = vst [vmem:[%s1998_s3 + $0x2a8] sm:$0xff] %v625_v26  ;;  %v988_v34 = vunpack.c.l.bf16 %v1103_v22  ;;  %v989_v35 = vunpack.c.h.bf16 %v1103_v22  ;;  %v365_v36 = vmul.f32 %v980_v30, %v1149_v1  ;;  %v366_v37 = vmul.f32 %v981_v31, %v1149_v1  ;;  %v1109_v26 = vld [vmem:[%s1995_s0 + $0x1a0] sm:$0xff]   ;;  %v1110_v31 = vld [vmem:[%s1995_s0 + $0x1a8] sm:$0xff]  }
  0x5c   :  { %754 = vst [vmem:[%s1998_s3 + $0x2b0] sm:$0xff] %v626_v28  ;;  %755 = vst [vmem:[%s1998_s3 + $0x2b8] sm:$0xff] %v627_v29  ;;  %v992_v38 = vunpack.c.l.bf16 %v1104_v27  ;;  %v993_v39 = vunpack.c.h.bf16 %v1104_v27  ;;  %v367_v40 = vmul.f32 %v984_v32, %v1149_v1  ;;  %v368_v41 = vmul.f32 %v985_v33, %v1149_v1  ;;  %v1111_v32 = vld [vmem:[%s1995_s0 + $0x1b0] sm:$0xff]  }
  0x5d   :  { %v369_v42 = vmul.f32 %v988_v34, %v1149_v1  ;;  %v370_v43 = vmul.f32 %v989_v35, %v1149_v1  ;;  %v500_v44 = vadd.f32 %v1163_v7, %v365_v36  ;;  %v501_v45 = vadd.f32 %v1163_v7, %v366_v37  ;;  %v1112_v37 = vld [vmem:[%s1995_s0 + $0x1b8] sm:$0xff]  }
  0x5e   :  { %v371_v46 = vmul.f32 %v992_v38, %v1149_v1  ;;  %v372_v47 = vmul.f32 %v993_v39, %v1149_v1  ;;  %v502_v48 = vadd.f32 %v1163_v7, %v367_v40  ;;  %v503_v49 = vadd.f32 %v1163_v7, %v368_v41  ;;  %v1106_v1 = vld [vmem:[%s1995_s0 + $0x188] sm:$0xff]  }
  0x5f   :  { %v504_v50 = vadd.f32 %v1163_v7, %v369_v42  ;;  %v505_v51 = vadd.f32 %v1163_v7, %v370_v43  ;;  %v628_v53 = vmax.f32 %v500_v44, 0.0  ;;  %v629_v54 = vmax.f32 %v501_v45, 0.0 }
  0x60   :  { %v506_v55 = vadd.f32 %v1163_v7, %v371_v46  ;;  %v507_v56 = vadd.f32 %v1163_v7, %v372_v47  ;;  %v630_v58 = vmax.f32 %v502_v48, 0.0  ;;  %v631_v59 = vmax.f32 %v503_v49, 0.0 }
  0x61   :  { %v632_v60 = vmax.f32 %v504_v50, 0.0  ;;  %v633_v61 = vmax.f32 %v505_v51, 0.0  ;;  %756 = vst [vmem:[%s1998_s3 + $0x2c0] sm:$0xff] %v628_v53  ;;  %757 = vst [vmem:[%s1998_s3 + $0x2c8] sm:$0xff] %v629_v54  ;;  %v996_v0 = vunpack.c.l.bf16 %v1105_v52  ;;  %v997_v2 = vunpack.c.h.bf16 %v1105_v52 }
  0x62   :  { %v634_v7 = vmax.f32 %v506_v55, 0.0  ;;  %v635_v63 = vmax.f32 %v507_v56, 0.0  ;;  %758 = vst [vmem:[%s1998_s3 + $0x2d0] sm:$0xff] %v630_v58  ;;  %759 = vst [vmem:[%s1998_s3 + $0x2d8] sm:$0xff] %v631_v59  ;;  %v1000_v3 = vunpack.c.l.bf16 %v1106_v1  ;;  %v1001_v4 = vunpack.c.h.bf16 %v1106_v1 }
  0x63   :  { %760 = vst [vmem:[%s1998_s3 + $0x2e0] sm:$0xff] %v632_v60  ;;  %761 = vst [vmem:[%s1998_s3 + $0x2e8] sm:$0xff] %v633_v61  ;;  %v1004_v5 = vunpack.c.l.bf16 %v1107_v57  ;;  %v1005_v6 = vunpack.c.h.bf16 %v1107_v57  ;;  %v373_v9 = vmul.f32 %v1792_v8, %v996_v0  ;;  %v374_v10 = vmul.f32 %v1792_v8, %v997_v2  ;;  %v1113_v61 = vld [vmem:[%s1995_s0 + $0x1c0] sm:$0xff]   ;;  %v1114_v2 = vld [vmem:[%s1995_s0 + $0x1c8] sm:$0xff]  }
  0x64   :  { %762 = vst [vmem:[%s1998_s3 + $0x2f0] sm:$0xff] %v634_v7  ;;  %763 = vst [vmem:[%s1998_s3 + $0x2f8] sm:$0xff] %v635_v63  ;;  %v1008_v11 = vunpack.c.l.bf16 %v1108_v62  ;;  %v1009_v12 = vunpack.c.h.bf16 %v1108_v62  ;;  %v375_v13 = vmul.f32 %v1792_v8, %v1000_v3  ;;  %v376_v14 = vmul.f32 %v1792_v8, %v1001_v4  ;;  %v1115_v3 = vld [vmem:[%s1995_s0 + $0x1d0] sm:$0xff]  }
  0x65   :  { %v377_v15 = vmul.f32 %v1792_v8, %v1004_v5  ;;  %v378_v16 = vmul.f32 %v1792_v8, %v1005_v6  ;;  %v508_v18 = vadd.f32 %v1803_v17, %v373_v9  ;;  %v509_v19 = vadd.f32 %v1803_v17, %v374_v10  ;;  %v1116_v10 = vld [vmem:[%s1995_s0 + $0x1d8] sm:$0xff]  }
  0x66   :  { %v379_v20 = vmul.f32 %v1792_v8, %v1008_v11  ;;  %v380_v21 = vmul.f32 %v1792_v8, %v1009_v12  ;;  %v510_v22 = vadd.f32 %v1803_v17, %v375_v13  ;;  %v511_v23 = vadd.f32 %v1803_v17, %v376_v14 }
  0x67   :  { %v512_v24 = vadd.f32 %v1803_v17, %v377_v15  ;;  %v513_v25 = vadd.f32 %v1803_v17, %v378_v16  ;;  %v636_v27 = vmax.f32 %v508_v18, 0.0  ;;  %v637_v28 = vmax.f32 %v509_v19, 0.0 }
  0x68   :  { %v514_v29 = vadd.f32 %v1803_v17, %v379_v20  ;;  %v515_v30 = vadd.f32 %v1803_v17, %v380_v21  ;;  %v638_v33 = vmax.f32 %v510_v22, 0.0  ;;  %v639_v34 = vmax.f32 %v511_v23, 0.0 }
  0x69   :  { %v640_v35 = vmax.f32 %v512_v24, 0.0  ;;  %v641_v36 = vmax.f32 %v513_v25, 0.0  ;;  %764 = vst [vmem:[%s1998_s3 + $0x300] sm:$0xff] %v636_v27  ;;  %765 = vst [vmem:[%s1998_s3 + $0x308] sm:$0xff] %v637_v28  ;;  %v1012_v40 = vunpack.c.l.bf16 %v1109_v26  ;;  %v1013_v41 = vunpack.c.h.bf16 %v1109_v26 }
  0x6a   :  { %v642_v38 = vmax.f32 %v514_v29, 0.0  ;;  %v643_v39 = vmax.f32 %v515_v30, 0.0  ;;  %766 = vst [vmem:[%s1998_s3 + $0x310] sm:$0xff] %v638_v33  ;;  %767 = vst [vmem:[%s1998_s3 + $0x318] sm:$0xff] %v639_v34  ;;  %v1016_v42 = vunpack.c.l.bf16 %v1110_v31  ;;  %v1017_v43 = vunpack.c.h.bf16 %v1110_v31 }
  0x6b   :  { %768 = vst [vmem:[%s1998_s3 + $0x320] sm:$0xff] %v640_v35  ;;  %769 = vst [vmem:[%s1998_s3 + $0x328] sm:$0xff] %v641_v36  ;;  %v1020_v44 = vunpack.c.l.bf16 %v1111_v32  ;;  %v1021_v45 = vunpack.c.h.bf16 %v1111_v32  ;;  %v381_v46 = vmul.f32 %v1792_v8, %v1012_v40  ;;  %v382_v47 = vmul.f32 %v1792_v8, %v1013_v41  ;;  %v1117_v36 = vld [vmem:[%s1995_s0 + $0x1e0] sm:$0xff]   ;;  %v1118_v41 = vld [vmem:[%s1995_s0 + $0x1e8] sm:$0xff]  }
  0x6c   :  { %770 = vst [vmem:[%s1998_s3 + $0x330] sm:$0xff] %v642_v38  ;;  %771 = vst [vmem:[%s1998_s3 + $0x338] sm:$0xff] %v643_v39  ;;  %v1024_v48 = vunpack.c.l.bf16 %v1112_v37  ;;  %v1025_v49 = vunpack.c.h.bf16 %v1112_v37  ;;  %v383_v50 = vmul.f32 %v1792_v8, %v1016_v42  ;;  %v384_v51 = vmul.f32 %v1792_v8, %v1017_v43  ;;  %v1119_v42 = vld [vmem:[%s1995_s0 + $0x1f0] sm:$0xff]  }
  0x6d   :  { %v385_v52 = vmul.f32 %v1792_v8, %v1020_v44  ;;  %v386_v53 = vmul.f32 %v1792_v8, %v1021_v45  ;;  %v516_v54 = vadd.f32 %v1803_v17, %v381_v46  ;;  %v517_v55 = vadd.f32 %v1803_v17, %v382_v47  ;;  %v1120_v47 = vld [vmem:[%s1995_s0 + $0x1f8] sm:$0xff]  }
  0x6e   :  { %v387_v56 = vmul.f32 %v1792_v8, %v1024_v48  ;;  %v388_v1 = vmul.f32 %v1792_v8, %v1025_v49  ;;  %v518_v57 = vadd.f32 %v1803_v17, %v383_v50  ;;  %v519_v58 = vadd.f32 %v1803_v17, %v384_v51 }
  0x6f   :  { %v520_v59 = vadd.f32 %v1803_v17, %v385_v52  ;;  %v521_v60 = vadd.f32 %v1803_v17, %v386_v53  ;;  %v644_v62 = vmax.f32 %v516_v54, 0.0  ;;  %v645_v7 = vmax.f32 %v517_v55, 0.0 }
  0x70   :  { %v522_v63 = vadd.f32 %v1803_v17, %v387_v56  ;;  %v523_v0 = vadd.f32 %v1803_v17, %v388_v1  ;;  %v646_v4 = vmax.f32 %v518_v57, 0.0  ;;  %v647_v5 = vmax.f32 %v519_v58, 0.0 }
  0x71   :  { %v648_v6 = vmax.f32 %v520_v59, 0.0  ;;  %v649_v9 = vmax.f32 %v521_v60, 0.0  ;;  %772 = vst [vmem:[%s1998_s3 + $0x340] sm:$0xff] %v644_v62  ;;  %773 = vst [vmem:[%s1998_s3 + $0x348] sm:$0xff] %v645_v7  ;;  %v1028_v13 = vunpack.c.l.bf16 %v1113_v61  ;;  %v1029_v14 = vunpack.c.h.bf16 %v1113_v61 }
  0x72   :  { %v650_v11 = vmax.f32 %v522_v63, 0.0  ;;  %v651_v12 = vmax.f32 %v523_v0, 0.0  ;;  %774 = vst [vmem:[%s1998_s3 + $0x350] sm:$0xff] %v646_v4  ;;  %775 = vst [vmem:[%s1998_s3 + $0x358] sm:$0xff] %v647_v5  ;;  %v1032_v15 = vunpack.c.l.bf16 %v1114_v2  ;;  %v1033_v16 = vunpack.c.h.bf16 %v1114_v2 }
  0x73   :  { %776 = vst [vmem:[%s1998_s3 + $0x360] sm:$0xff] %v648_v6  ;;  %777 = vst [vmem:[%s1998_s3 + $0x368] sm:$0xff] %v649_v9  ;;  %v1036_v18 = vunpack.c.l.bf16 %v1115_v3  ;;  %v1037_v19 = vunpack.c.h.bf16 %v1115_v3  ;;  %v389_v20 = vmul.f32 %v1792_v8, %v1028_v13  ;;  %v390_v21 = vmul.f32 %v1792_v8, %v1029_v14 }
  0x74   :  { %778 = vst [vmem:[%s1998_s3 + $0x370] sm:$0xff] %v650_v11  ;;  %779 = vst [vmem:[%s1998_s3 + $0x378] sm:$0xff] %v651_v12  ;;  %v1040_v22 = vunpack.c.l.bf16 %v1116_v10  ;;  %v1041_v23 = vunpack.c.h.bf16 %v1116_v10  ;;  %v391_v24 = vmul.f32 %v1792_v8, %v1032_v15  ;;  %v392_v25 = vmul.f32 %v1792_v8, %v1033_v16 }
  0x75   :  { %v393_v26 = vmul.f32 %v1792_v8, %v1036_v18  ;;  %v394_v27 = vmul.f32 %v1792_v8, %v1037_v19  ;;  %v524_v28 = vadd.f32 %v1803_v17, %v389_v20  ;;  %v525_v29 = vadd.f32 %v1803_v17, %v390_v21 }
  0x76   :  { %v395_v30 = vmul.f32 %v1792_v8, %v1040_v22  ;;  %v396_v31 = vmul.f32 %v1792_v8, %v1041_v23  ;;  %v526_v32 = vadd.f32 %v1803_v17, %v391_v24  ;;  %v527_v33 = vadd.f32 %v1803_v17, %v392_v25 }
  0x77   :  { %v528_v34 = vadd.f32 %v1803_v17, %v393_v26  ;;  %v529_v35 = vadd.f32 %v1803_v17, %v394_v27  ;;  %v652_v37 = vmax.f32 %v524_v28, 0.0  ;;  %v653_v38 = vmax.f32 %v525_v29, 0.0 }
  0x78   :  { %v530_v39 = vadd.f32 %v1803_v17, %v395_v30  ;;  %v531_v40 = vadd.f32 %v1803_v17, %v396_v31  ;;  %v654_v43 = vmax.f32 %v526_v32, 0.0  ;;  %v655_v44 = vmax.f32 %v527_v33, 0.0 }
  0x79   :  { %v656_v45 = vmax.f32 %v528_v34, 0.0  ;;  %v657_v46 = vmax.f32 %v529_v35, 0.0  ;;  %780 = vst [vmem:[%s1998_s3 + $0x380] sm:$0xff] %v652_v37  ;;  %781 = vst [vmem:[%s1998_s3 + $0x388] sm:$0xff] %v653_v38  ;;  %v1044_v50 = vunpack.c.l.bf16 %v1117_v36  ;;  %v1045_v51 = vunpack.c.h.bf16 %v1117_v36 }
  0x7a   :  { %v658_v48 = vmax.f32 %v530_v39, 0.0  ;;  %v659_v49 = vmax.f32 %v531_v40, 0.0  ;;  %782 = vst [vmem:[%s1998_s3 + $0x390] sm:$0xff] %v654_v43  ;;  %783 = vst [vmem:[%s1998_s3 + $0x398] sm:$0xff] %v655_v44  ;;  %v1048_v52 = vunpack.c.l.bf16 %v1118_v41  ;;  %v1049_v53 = vunpack.c.h.bf16 %v1118_v41 }
  0x7b   :  { %784 = vst [vmem:[%s1998_s3 + $0x3a0] sm:$0xff] %v656_v45  ;;  %785 = vst [vmem:[%s1998_s3 + $0x3a8] sm:$0xff] %v657_v46  ;;  %v1052_v54 = vunpack.c.l.bf16 %v1119_v42  ;;  %v1053_v55 = vunpack.c.h.bf16 %v1119_v42  ;;  %v397_v56 = vmul.f32 %v1792_v8, %v1044_v50  ;;  %v398_v1 = vmul.f32 %v1792_v8, %v1045_v51 }
  0x7c   :  { %786 = vst [vmem:[%s1998_s3 + $0x3b0] sm:$0xff] %v658_v48  ;;  %787 = vst [vmem:[%s1998_s3 + $0x3b8] sm:$0xff] %v659_v49  ;;  %v1056_v57 = vunpack.c.l.bf16 %v1120_v47  ;;  %v1057_v58 = vunpack.c.h.bf16 %v1120_v47  ;;  %v399_v59 = vmul.f32 %v1792_v8, %v1048_v52  ;;  %v400_v60 = vmul.f32 %v1792_v8, %v1049_v53 }
  0x7d   :  { %v401_v61 = vmul.f32 %v1792_v8, %v1052_v54  ;;  %v402_v62 = vmul.f32 %v1792_v8, %v1053_v55  ;;  %v532_v7 = vadd.f32 %v1803_v17, %v397_v56  ;;  %v533_v63 = vadd.f32 %v1803_v17, %v398_v1 }
  0x7e   :  { %v403_v0 = vmul.f32 %v1792_v8, %v1056_v57  ;;  %v404_v2 = vmul.f32 %v1792_v8, %v1057_v58  ;;  %v534_v3 = vadd.f32 %v1803_v17, %v399_v59  ;;  %v535_v4 = vadd.f32 %v1803_v17, %v400_v60 }
  0x7f   :  { %v536_v5 = vadd.f32 %v1803_v17, %v401_v61  ;;  %v537_v6 = vadd.f32 %v1803_v17, %v402_v62  ;;  %v660_v9 = vmax.f32 %v532_v7, 0.0  ;;  %v661_v10 = vmax.f32 %v533_v63, 0.0 }
  0x80   :  { %v538_v11 = vadd.f32 %v1803_v17, %v403_v0  ;;  %v539_v12 = vadd.f32 %v1803_v17, %v404_v2  ;;  %v662_v13 = vmax.f32 %v534_v3, 0.0  ;;  %v663_v14 = vmax.f32 %v535_v4, 0.0 }
  0x81   :  { %v664_v15 = vmax.f32 %v536_v5, 0.0  ;;  %v665_v16 = vmax.f32 %v537_v6, 0.0  ;;  %788 = vst [vmem:[%s1998_s3 + $0x3c0] sm:$0xff] %v660_v9  ;;  %789 = vst [vmem:[%s1998_s3 + $0x3c8] sm:$0xff] %v661_v10 }
  0x82   :  { %v666_v8 = vmax.f32 %v538_v11, 0.0  ;;  %v667_v18 = vmax.f32 %v539_v12, 0.0  ;;  %790 = vst [vmem:[%s1998_s3 + $0x3d0] sm:$0xff] %v662_v13  ;;  %791 = vst [vmem:[%s1998_s3 + $0x3d8] sm:$0xff] %v663_v14 }
  0x83   :  { %792 = vst [vmem:[%s1998_s3 + $0x3e0] sm:$0xff] %v664_v15  ;;  %793 = vst [vmem:[%s1998_s3 + $0x3e8] sm:$0xff] %v665_v16 }
  0x84   :  { %794 = vst [vmem:[%s1998_s3 + $0x3f0] sm:$0xff] %v666_v8  ;;  %795 = vst [vmem:[%s1998_s3 + $0x3f8] sm:$0xff] %v667_v18 }

</bundles_post_ra>
